<compile_context>
chip_gen: v6e
topology: v6e:2x2x1
jax: 0.10.0
libtpu: 0.0.40
codegen_flags: <defaults>
</compile_context>

<pallas_src>
import functools

import jax
import jax.numpy as jnp
from jax import lax
from jax.experimental import pallas as pl
from jax.experimental.pallas import tpu as pltpu

BN_EPS = 1e-5
LANE = 128
SUBLANE = 8
VMEM_LIMIT_BYTES = 64 * 1024 * 1024


def _round_up(x, m):
    return (x + m - 1) // m * m


# --------------------------------------------------------------------------- #
# Pass 1: fused-im2col conv (static per-tap shifted slices of a 2-block window)
#         + per-tile masked BN partial statistics.
# --------------------------------------------------------------------------- #
def _conv_stats_kernel(x0_ref, x1_ref, w_ref, mask_ref, y_ref, stats_ref, *,
                       ksize, dilation, w_pitch):
    """x0_ref/x1_ref: (1, TM, C_in_p) f32   two consecutive row-blocks of the flattened image
       w_ref:         (K*K, C_in_p, Cp) bf16 per-tap weight slices (VMEM-resident)
       mask_ref:      (TM, 1) f32            1.0 where the row is a real conv output
       y_ref:         (1, TM, Cp) bf16       pre-BN conv output tile ("wide" row layout)
       stats_ref:     (1, 1, 2, Cp) f32      row 0 = masked sum(y), row 1 = masked sum(y*y)"""
    tile_m = y_ref.shape[1]
    c_pad = y_ref.shape[2]
    # Static 2*TM-row window: every tap offset (<= TM by wrapper construction) is a static
    # slice, so there is no dynamic / unaligned VMEM indexing anywhere in the kernel.
    win = jnp.concatenate([x0_ref[0, :, :], x1_ref[0, :, :]], axis=0)   # (2*TM, C_in_p) f32
    acc = jnp.zeros((tile_m, c_pad), jnp.float32)
    for ki in range(ksize):                      # static unroll over the K*K taps
        for kj in range(ksize):
            off = (ki * w_pitch + kj) * dilation
            lhs = win[off:off + tile_m, :].astype(jnp.bfloat16)         # (TM, C_in_p)
            acc += jnp.dot(lhs, w_ref[ki * ksize + kj, :, :],
                           preferred_element_type=jnp.float32)
    y_ref[0, :, :] = acc.astype(y_ref.dtype)     # bf16 intermediate -> less HBM traffic

    yv = acc * mask_ref[...]                     # zero out wide-garbage / padding rows
    stats_ref[0, 0, :, :] = jnp.concatenate(
        [jnp.sum(yv, axis=0, keepdims=True),
         jnp.sum(yv * yv, axis=0, keepdims=True)], axis=0)


# --------------------------------------------------------------------------- #
# Pass 2: apply per-channel BN affine (precomputed scale/shift) + ReLU, f32 math.
# --------------------------------------------------------------------------- #
def _bn_relu_kernel(y_ref, scale_ref, shift_ref, o_ref):
    y = y_ref[...].astype(jnp.float32)
    o_ref[...] = jnp.maximum(y * scale_ref[...] + shift_ref[...], 0.0)


@functools.partial(
    jax.jit, static_argnames=("kernel", "stride", "padding", "dilation", "tile_m"))
def conv_bn_relu(x_nchw, weight_oihw, gamma, beta, *, kernel, stride=1, padding=0,
                 dilation=1, tile_m=256):
    """ConvBnRelu forward (enable_bn=True, enable_relu=True). x: (N, C_in, H, W) NCHW.
    Returns (N, C_out, H_out, W_out) f32."""
    if stride != 1:
        raise NotImplementedError("fused ConvBnRelu Pallas path supports stride=1 only")

    n, c_in, h, w = x_nchw.shape
    c_out = weight_oihw.shape[0]
    k, d, p = kernel, dilation, padding

    h_pad = h + 2 * p
    w_pitch = w + 2 * p                       # row pitch of the flattened padded image
    h_out = h_pad - d * (k - 1)
    w_out = w_pitch - d * (k - 1)
    assert h_out > 0 and w_out > 0

    c_in_p = _round_up(c_in, SUBLANE)
    c_pad = _round_up(c_out, LANE)
    off_max = (k - 1) * d * (w_pitch + 1)     # largest tap offset in flattened rows
    tile_m = _round_up(max(tile_m, off_max), LANE)   # 2-block window must cover off_max

    m_wide = h_out * w_pitch                  # per-image rows in the "wide" stride-1 layout
    mt = pl.cdiv(m_wide, tile_m)
    m_wide_pad = mt * tile_m
    l_in = h_pad * w_pitch
    l_in_pad = max(_round_up(l_in, tile_m), (mt + 1) * tile_m)   # +1 block for the i+1 view

    # Flattened padded image (f32 so the in-kernel window slices stay unpacked; taps are cast
    # to bf16 right before the MXU).  This replaces the K*K-expanded im2col HBM intermediate.
    x_nhwc = jnp.pad(x_nchw.astype(jnp.float32).transpose(0, 2, 3, 1),
                     ((0, 0), (p, p), (p, p), (0, 0)))
    x_flat = jnp.zeros((n, l_in_pad, c_in_p), jnp.float32)
    x_flat = x_flat.at[:, :l_in, :c_in].set(x_nhwc.reshape(n, l_in, c_in))

    # Conv weight OIHW -> one (C_in, C_out) slice per tap, padded, bf16 (no f32 intermediate).
    w_taps = weight_oihw.astype(jnp.bfloat16).transpose(2, 3, 1, 0).reshape(k * k, c_in, c_out)
    w_p = jnp.zeros((k * k, c_in_p, c_pad), jnp.bfloat16).at[:, :c_in, :c_out].set(w_taps)

    # 1.0 for rows that are real conv outputs; 0.0 for wide-garbage columns / padding rows.
    p_idx = jnp.arange(m_wide_pad, dtype=jnp.int32)
    mask = (((p_idx % w_pitch) < w_out) & (p_idx < m_wide)).astype(jnp.float32)
    mask = mask.reshape(m_wide_pad, 1)

    # ---- pass 1: fused conv + per-tile masked BN partials ----
    kfn = functools.partial(_conv_stats_kernel, ksize=k, dilation=d, w_pitch=w_pitch)
    y_wide, stats = pl.pallas_call(
        kfn,
        out_shape=(
            jax.ShapeDtypeStruct((n, m_wide_pad, c_pad), jnp.bfloat16),
            jax.ShapeDtypeStruct((n, mt, 2, c_pad), jnp.float32),
        ),
        grid=(n, mt),
        in_specs=[
            pl.BlockSpec((1, tile_m, c_in_p), lambda b, i: (b, i, 0)),
            pl.BlockSpec((1, tile_m, c_in_p), lambda b, i: (b, i + 1, 0)),
            pl.BlockSpec((k * k, c_in_p, c_pad), lambda b, i: (0, 0, 0)),  # VMEM-resident
            pl.BlockSpec((tile_m, 1), lambda b, i: (i, 0)),
        ],
        out_specs=(
            pl.BlockSpec((1, tile_m, c_pad), lambda b, i: (b, i, 0)),
            pl.BlockSpec((1, 1, 2, c_pad), lambda b, i: (b, i, 0, 0)),
        ),
        compiler_params=pltpu.CompilerParams(
            dimension_semantics=("parallel", "arbitrary"),
            vmem_limit_bytes=VMEM_LIMIT_BYTES,
        ),
    )(x_flat, x_flat, w_p, mask)

    # ---- tiny cross-tile BN reduction in plain JAX (masked partials => exact counts) ----
    count = n * h_out * w_out
    sum_y = jnp.sum(stats[:, :, 0, :], axis=(0, 1))
    sum_yy = jnp.sum(stats[:, :, 1, :], axis=(0, 1))
    mean = sum_y / count
    var = jnp.maximum(sum_yy / count - mean * mean, 0.0)     # biased batch variance
    # TODO(synk): switch to per-tile shifted sums if conv outputs are far from zero-mean
    #             (E[y^2]-E[y]^2 cancels in f32 when |mean| >> std).
    gamma_p = jnp.zeros((c_pad,), jnp.float32).at[:c_out].set(gamma.astype(jnp.float32))
    beta_p = jnp.zeros((c_pad,), jnp.float32).at[:c_out].set(beta.astype(jnp.float32))
    scale_vec = gamma_p * lax.rsqrt(var + BN_EPS)
    shift_vec = beta_p - mean * scale_vec
    scale = scale_vec.reshape(1, c_pad)
    shift = shift_vec.reshape(1, c_pad)

    # ---- pass 2: y*scale + shift, ReLU.  Large mem-bound tiles, decoupled from tile_m. ----
    total = n * m_wide_pad
    tb = tile_m
    while tb * 2 <= 8192 and total % (tb * 2) == 0:
        tb *= 2
    out_flat = pl.pallas_call(
        _bn_relu_kernel,
        out_shape=jax.ShapeDtypeStruct((total, c_pad), jnp.float32),
        grid=(total // tb,),
        in_specs=[
            pl.BlockSpec((tb, c_pad), lambda i: (i, 0)),
            pl.BlockSpec((1, c_pad), lambda i: (0, 0)),
            pl.BlockSpec((1, c_pad), lambda i: (0, 0)),
        ],
        out_specs=pl.BlockSpec((tb, c_pad), lambda i: (i, 0)),
        compiler_params=pltpu.CompilerParams(
            dimension_semantics=("parallel",),
            vmem_limit_bytes=VMEM_LIMIT_BYTES,
        ),
    )(y_wide.reshape(total, c_pad), scale, shift)

    # Crop the wide-garbage columns / padding rows, back to NCHW (PyTorch layout).
    out = out_flat.reshape(n, m_wide_pad, c_pad)[:, :m_wide, :]
    out = out.reshape(n, h_out, w_pitch, c_pad)[:, :, :w_out, :c_out]
    return out.transpose(0, 3, 1, 2)


def _reference(x_nchw, weight_oihw, gamma, beta, *, kernel, stride, padding, dilation):
    """Pure-JAX/XLA reference with the kernel's precision path: bf16 conv inputs, f32
    accumulation, bf16 storage of the pre-BN activation, f32 BN (training-mode) + ReLU."""
    y = lax.conv_general_dilated(
        x_nchw.astype(jnp.bfloat16),
        weight_oihw.astype(jnp.bfloat16),
        window_strides=(stride, stride),
        padding=[(padding, padding), (padding, padding)],
        rhs_dilation=(dilation, dilation),
        dimension_numbers=("NCHW", "OIHW", "NCHW"),
        preferred_element_type=jnp.float32,
    )
    mean = jnp.mean(y, axis=(0, 2, 3), keepdims=True)
    var = jnp.mean((y - mean) ** 2, axis=(0, 2, 3), keepdims=True)
    y = y.astype(jnp.bfloat16).astype(jnp.float32)   # match the kernel's bf16 y intermediate
    y = (y - mean) * lax.rsqrt(var + BN_EPS)
    y = y * gamma.reshape(1, -1, 1, 1) + beta.reshape(1, -1, 1, 1)
    return jnp.maximum(y, 0.0)


if __name__ == "__main__":
    # Module config: ConvBnRelu(input_channel=4, output_channel=8, kernel=3,
    #                           stride=1, padding=1, enable_bn=True, enable_relu=True)
    N, C_IN, H, W = 2, 4, 16, 16
    C_OUT, K, STRIDE, PAD, DIL = 8, 3, 1, 1, 1

    key = jax.random.PRNGKey(0)
    kx, kw, kg, kb = jax.random.split(key, 4)

    x = jax.random.normal(kx, (N, C_IN, H, W), dtype=jnp.float32)
    # Conv2d weight (OIHW); bias=False because enable_bn=True.
    weight = jax.random.normal(kw, (C_OUT, C_IN, K, K), dtype=jnp.float32) * 0.1
    gamma = 1.0 + 0.1 * jax.random.normal(kg, (C_OUT,), dtype=jnp.float32)
    beta = 0.1 * jax.random.normal(kb, (C_OUT,), dtype=jnp.float32)

    # tile_m=128 so the toy shape (per-image wide rows = 16*18 = 288 -> 3 tiles) exercises a
    # multi-tile grid and the cross-tile BN reduction; use the default (256) for real sizes.
    out = conv_bn_relu(x, weight, gamma, beta, kernel=K, stride=STRIDE, padding=PAD,
                       dilation=DIL, tile_m=128)
    out = jax.block_until_ready(out)

    ref = jax.block_until_ready(_reference(x, weight, gamma, beta, kernel=K, stride=STRIDE,
                                           padding=PAD, dilation=DIL))

    assert out.shape == (N, C_OUT, H, W), out.shape
    # bf16 storage of the pre-BN activation bounds elementwise error to ~2^-9 relative of y
    # (<~0.5% of the normalized output), hence the 5e-3 tolerances.
    max_err = float(jnp.max(jnp.abs(out - ref)))
    assert jnp.allclose(out, ref, atol=5e-3, rtol=5e-3), max_err
    print("KERNEL_OK")
</pallas_src>

<mosaic_0001>
module attributes {stable_mosaic.version = 11 : i64} {
  func.func @_conv_stats_kernel(%arg0: i32, %arg1: i32, %arg2: memref<1x128x8xf32, #tpu.memory_space<vmem>>, %arg3: memref<1x128x8xf32, #tpu.memory_space<vmem>>, %arg4: memref<9x8x128xbf16, #tpu.memory_space<vmem>>, %arg5: memref<128x1xf32, #tpu.memory_space<vmem>>, %arg6: memref<1x128x128xbf16, #tpu.memory_space<vmem>>, %arg7: memref<1x1x2x128xf32, #tpu.memory_space<vmem>>) attributes {dimension_semantics = [#tpu.dimension_semantics<parallel>, #tpu.dimension_semantics<arbitrary>], iteration_bounds = array<i64: 2, 3>, scalar_prefetch = 0 : i64, scratch_operands = 0 : i64, tpu.core_type = #tpu.core_type<tc>, window_params = [{transform_indices = @transform_0, window_bounds = array<i64: 1, 128, 8>}, {transform_indices = @transform_1, window_bounds = array<i64: 1, 128, 8>}, {pipeline_mode = #tpu.pipeline_mode<synchronous>, transform_indices = @transform_2, window_bounds = array<i64: 9, 8, 128>}, {transform_indices = @transform_3, window_bounds = array<i64: 128, 1>}, {transform_indices = @transform_4, window_bounds = array<i64: 1, 128, 128>}, {transform_indices = @transform_5, window_bounds = array<i64: 1, 1, 2, 128>}]} {
    %c0 = arith.constant 0 : index
    %c0_0 = arith.constant 0 : index
    %c0_1 = arith.constant 0 : index
    %0 = vector.load %arg2[%c0, %c0_0, %c0_1] : memref<1x128x8xf32, #tpu.memory_space<vmem>>, vector<1x128x8xf32>
    %1 = vector.shape_cast %0 : vector<1x128x8xf32> to vector<128x8xf32>
    %c0_2 = arith.constant 0 : index
    %c0_3 = arith.constant 0 : index
    %c0_4 = arith.constant 0 : index
    %2 = vector.load %arg3[%c0_2, %c0_3, %c0_4] : memref<1x128x8xf32, #tpu.memory_space<vmem>>, vector<1x128x8xf32>
    %3 = vector.shape_cast %2 : vector<1x128x8xf32> to vector<128x8xf32>
    %4 = tpu.concatenate %1, %3 in 0 : vector<128x8xf32>, vector<128x8xf32> -> vector<256x8xf32>
    %cst = arith.constant 0.000000e+00 : f32
    %5 = vector.broadcast %cst : f32 to vector<128x128xf32>
    %6 = vector.extract_strided_slice %4 {offsets = [0, 0], sizes = [128, 8], strides = [1, 1]} : vector<256x8xf32> to vector<128x8xf32>
    %7 = arith.truncf %6 : vector<128x8xf32> to vector<128x8xbf16>
    %c0_5 = arith.constant 0 : index
    %c0_6 = arith.constant 0 : index
    %c0_7 = arith.constant 0 : index
    %8 = vector.load %arg4[%c0_5, %c0_6, %c0_7] : memref<9x8x128xbf16, #tpu.memory_space<vmem>>, vector<1x8x128xbf16>
    %9 = vector.shape_cast %8 : vector<1x8x128xbf16> to vector<8x128xbf16>
    %cst_8 = arith.constant dense<0.000000e+00> : vector<128x128xf32>
    %10 = tpu.matmul %7, %9, %cst_8 {dimension_numbers = #tpu.dot_dimension_numbers<[1], [0], [0], [1], [0, 0, 1, 1], [], []>} : vector<128x8xbf16>, vector<8x128xbf16>, vector<128x128xf32> -> vector<128x128xf32>
    %11 = arith.addf %5, %10 : vector<128x128xf32>
    %12 = vector.extract_strided_slice %4 {offsets = [1, 0], sizes = [128, 8], strides = [1, 1]} : vector<256x8xf32> to vector<128x8xf32>
    %13 = arith.truncf %12 : vector<128x8xf32> to vector<128x8xbf16>
    %c1 = arith.constant 1 : index
    %c0_9 = arith.constant 0 : index
    %c0_10 = arith.constant 0 : index
    %14 = vector.load %arg4[%c1, %c0_9, %c0_10] : memref<9x8x128xbf16, #tpu.memory_space<vmem>>, vector<1x8x128xbf16>
    %15 = vector.shape_cast %14 : vector<1x8x128xbf16> to vector<8x128xbf16>
    %cst_11 = arith.constant dense<0.000000e+00> : vector<128x128xf32>
    %16 = tpu.matmul %13, %15, %cst_11 {dimension_numbers = #tpu.dot_dimension_numbers<[1], [0], [0], [1], [0, 0, 1, 1], [], []>} : vector<128x8xbf16>, vector<8x128xbf16>, vector<128x128xf32> -> vector<128x128xf32>
    %17 = arith.addf %11, %16 : vector<128x128xf32>
    %18 = vector.extract_strided_slice %4 {offsets = [2, 0], sizes = [128, 8], strides = [1, 1]} : vector<256x8xf32> to vector<128x8xf32>
    %19 = arith.truncf %18 : vector<128x8xf32> to vector<128x8xbf16>
    %c2 = arith.constant 2 : index
    %c0_12 = arith.constant 0 : index
    %c0_13 = arith.constant 0 : index
    %20 = vector.load %arg4[%c2, %c0_12, %c0_13] : memref<9x8x128xbf16, #tpu.memory_space<vmem>>, vector<1x8x128xbf16>
    %21 = vector.shape_cast %20 : vector<1x8x128xbf16> to vector<8x128xbf16>
    %cst_14 = arith.constant dense<0.000000e+00> : vector<128x128xf32>
    %22 = tpu.matmul %19, %21, %cst_14 {dimension_numbers = #tpu.dot_dimension_numbers<[1], [0], [0], [1], [0, 0, 1, 1], [], []>} : vector<128x8xbf16>, vector<8x128xbf16>, vector<128x128xf32> -> vector<128x128xf32>
    %23 = arith.addf %17, %22 : vector<128x128xf32>
    %24 = vector.extract_strided_slice %4 {offsets = [18, 0], sizes = [128, 8], strides = [1, 1]} : vector<256x8xf32> to vector<128x8xf32>
    %25 = arith.truncf %24 : vector<128x8xf32> to vector<128x8xbf16>
    %c3 = arith.constant 3 : index
    %c0_15 = arith.constant 0 : index
    %c0_16 = arith.constant 0 : index
    %26 = vector.load %arg4[%c3, %c0_15, %c0_16] : memref<9x8x128xbf16, #tpu.memory_space<vmem>>, vector<1x8x128xbf16>
    %27 = vector.shape_cast %26 : vector<1x8x128xbf16> to vector<8x128xbf16>
    %cst_17 = arith.constant dense<0.000000e+00> : vector<128x128xf32>
    %28 = tpu.matmul %25, %27, %cst_17 {dimension_numbers = #tpu.dot_dimension_numbers<[1], [0], [0], [1], [0, 0, 1, 1], [], []>} : vector<128x8xbf16>, vector<8x128xbf16>, vector<128x128xf32> -> vector<128x128xf32>
    %29 = arith.addf %23, %28 : vector<128x128xf32>
    %30 = vector.extract_strided_slice %4 {offsets = [19, 0], sizes = [128, 8], strides = [1, 1]} : vector<256x8xf32> to vector<128x8xf32>
    %31 = arith.truncf %30 : vector<128x8xf32> to vector<128x8xbf16>
    %c4 = arith.constant 4 : index
    %c0_18 = arith.constant 0 : index
    %c0_19 = arith.constant 0 : index
    %32 = vector.load %arg4[%c4, %c0_18, %c0_19] : memref<9x8x128xbf16, #tpu.memory_space<vmem>>, vector<1x8x128xbf16>
    %33 = vector.shape_cast %32 : vector<1x8x128xbf16> to vector<8x128xbf16>
    %cst_20 = arith.constant dense<0.000000e+00> : vector<128x128xf32>
    %34 = tpu.matmul %31, %33, %cst_20 {dimension_numbers = #tpu.dot_dimension_numbers<[1], [0], [0], [1], [0, 0, 1, 1], [], []>} : vector<128x8xbf16>, vector<8x128xbf16>, vector<128x128xf32> -> vector<128x128xf32>
    %35 = arith.addf %29, %34 : vector<128x128xf32>
    %36 = vector.extract_strided_slice %4 {offsets = [20, 0], sizes = [128, 8], strides = [1, 1]} : vector<256x8xf32> to vector<128x8xf32>
    %37 = arith.truncf %36 : vector<128x8xf32> to vector<128x8xbf16>
    %c5 = arith.constant 5 : index
    %c0_21 = arith.constant 0 : index
    %c0_22 = arith.constant 0 : index
    %38 = vector.load %arg4[%c5, %c0_21, %c0_22] : memref<9x8x128xbf16, #tpu.memory_space<vmem>>, vector<1x8x128xbf16>
    %39 = vector.shape_cast %38 : vector<1x8x128xbf16> to vector<8x128xbf16>
    %cst_23 = arith.constant dense<0.000000e+00> : vector<128x128xf32>
    %40 = tpu.matmul %37, %39, %cst_23 {dimension_numbers = #tpu.dot_dimension_numbers<[1], [0], [0], [1], [0, 0, 1, 1], [], []>} : vector<128x8xbf16>, vector<8x128xbf16>, vector<128x128xf32> -> vector<128x128xf32>
    %41 = arith.addf %35, %40 : vector<128x128xf32>
    %42 = vector.extract_strided_slice %4 {offsets = [36, 0], sizes = [128, 8], strides = [1, 1]} : vector<256x8xf32> to vector<128x8xf32>
    %43 = arith.truncf %42 : vector<128x8xf32> to vector<128x8xbf16>
    %c6 = arith.constant 6 : index
    %c0_24 = arith.constant 0 : index
    %c0_25 = arith.constant 0 : index
    %44 = vector.load %arg4[%c6, %c0_24, %c0_25] : memref<9x8x128xbf16, #tpu.memory_space<vmem>>, vector<1x8x128xbf16>
    %45 = vector.shape_cast %44 : vector<1x8x128xbf16> to vector<8x128xbf16>
    %cst_26 = arith.constant dense<0.000000e+00> : vector<128x128xf32>
    %46 = tpu.matmul %43, %45, %cst_26 {dimension_numbers = #tpu.dot_dimension_numbers<[1], [0], [0], [1], [0, 0, 1, 1], [], []>} : vector<128x8xbf16>, vector<8x128xbf16>, vector<128x128xf32> -> vector<128x128xf32>
    %47 = arith.addf %41, %46 : vector<128x128xf32>
    %48 = vector.extract_strided_slice %4 {offsets = [37, 0], sizes = [128, 8], strides = [1, 1]} : vector<256x8xf32> to vector<128x8xf32>
    %49 = arith.truncf %48 : vector<128x8xf32> to vector<128x8xbf16>
    %c7 = arith.constant 7 : index
    %c0_27 = arith.constant 0 : index
    %c0_28 = arith.constant 0 : index
    %50 = vector.load %arg4[%c7, %c0_27, %c0_28] : memref<9x8x128xbf16, #tpu.memory_space<vmem>>, vector<1x8x128xbf16>
    %51 = vector.shape_cast %50 : vector<1x8x128xbf16> to vector<8x128xbf16>
    %cst_29 = arith.constant dense<0.000000e+00> : vector<128x128xf32>
    %52 = tpu.matmul %49, %51, %cst_29 {dimension_numbers = #tpu.dot_dimension_numbers<[1], [0], [0], [1], [0, 0, 1, 1], [], []>} : vector<128x8xbf16>, vector<8x128xbf16>, vector<128x128xf32> -> vector<128x128xf32>
    %53 = arith.addf %47, %52 : vector<128x128xf32>
    %54 = vector.extract_strided_slice %4 {offsets = [38, 0], sizes = [128, 8], strides = [1, 1]} : vector<256x8xf32> to vector<128x8xf32>
    %55 = arith.truncf %54 : vector<128x8xf32> to vector<128x8xbf16>
    %c8 = arith.constant 8 : index
    %c0_30 = arith.constant 0 : index
    %c0_31 = arith.constant 0 : index
    %56 = vector.load %arg4[%c8, %c0_30, %c0_31] : memref<9x8x128xbf16, #tpu.memory_space<vmem>>, vector<1x8x128xbf16>
    %57 = vector.shape_cast %56 : vector<1x8x128xbf16> to vector<8x128xbf16>
    %cst_32 = arith.constant dense<0.000000e+00> : vector<128x128xf32>
    %58 = tpu.matmul %55, %57, %cst_32 {dimension_numbers = #tpu.dot_dimension_numbers<[1], [0], [0], [1], [0, 0, 1, 1], [], []>} : vector<128x8xbf16>, vector<8x128xbf16>, vector<128x128xf32> -> vector<128x128xf32>
    %59 = arith.addf %53, %58 : vector<128x128xf32>
    %60 = arith.truncf %59 : vector<128x128xf32> to vector<128x128xbf16>
    %c0_33 = arith.constant 0 : index
    %c0_34 = arith.constant 0 : index
    %c0_35 = arith.constant 0 : index
    %61 = vector.load %arg6[%c0_33, %c0_34, %c0_35] : memref<1x128x128xbf16, #tpu.memory_space<vmem>>, vector<1x128x128xbf16>
    %62 = vector.shape_cast %61 : vector<1x128x128xbf16> to vector<128x128xbf16>
    %63 = vector.shape_cast %60 : vector<128x128xbf16> to vector<1x128x128xbf16>
    tpu.vector_store %arg6[%c0_33, %c0_34, %c0_35], %63 {strides = array<i32>} : memref<1x128x128xbf16, #tpu.memory_space<vmem>>, vector<1x128x128xbf16>,
    %c0_36 = arith.constant 0 : index
    %c0_37 = arith.constant 0 : index
    %64 = vector.load %arg5[%c0_36, %c0_37] : memref<128x1xf32, #tpu.memory_space<vmem>>, vector<128x1xf32>
    %65 = vector.broadcast %64 : vector<128x1xf32> to vector<128x128xf32>
    %66 = arith.mulf %59, %65 : vector<128x128xf32>
    %cst_38 = arith.constant dense<0.000000e+00> : vector<128xf32>
    %67 = vector.multi_reduction <add>, %66, %cst_38 [0] : vector<128x128xf32> to vector<128xf32>
    %68 = vector.shape_cast %67 : vector<128xf32> to vector<1x128xf32>
    %69 = arith.mulf %66, %66 : vector<128x128xf32>
    %cst_39 = arith.constant dense<0.000000e+00> : vector<128xf32>
    %70 = vector.multi_reduction <add>, %69, %cst_39 [0] : vector<128x128xf32> to vector<128xf32>
    %71 = vector.shape_cast %70 : vector<128xf32> to vector<1x128xf32>
    %72 = tpu.concatenate %68, %71 in 0 : vector<1x128xf32>, vector<1x128xf32> -> vector<2x128xf32>
    %c0_40 = arith.constant 0 : index
    %c0_41 = arith.constant 0 : index
    %c0_42 = arith.constant 0 : index
    %c0_43 = arith.constant 0 : index
    %73 = vector.load %arg7[%c0_40, %c0_41, %c0_42, %c0_43] : memref<1x1x2x128xf32, #tpu.memory_space<vmem>>, vector<1x1x2x128xf32>
    %74 = vector.shape_cast %73 : vector<1x1x2x128xf32> to vector<2x128xf32>
    %75 = vector.shape_cast %72 : vector<2x128xf32> to vector<1x1x2x128xf32>
    tpu.vector_store %arg7[%c0_40, %c0_41, %c0_42, %c0_43], %75 {strides = array<i32>} : memref<1x1x2x128xf32, #tpu.memory_space<vmem>>, vector<1x1x2x128xf32>,
    return
  }
  func.func @transform_0(%arg0: i32, %arg1: i32) -> (i32, i32, i32) {
    %c0_i32 = arith.constant 0 : i32
    %c0_i32_0 = arith.constant 0 : i32
    return %arg0, %arg1, %c0_i32 : i32, i32, i32
  }
  func.func @transform_1(%arg0: i32, %arg1: i32) -> (i32, i32, i32) {
    %c1_i32 = arith.constant 1 : i32
    %0 = arith.addi %arg1, %c1_i32 : i32
    %c0_i32 = arith.constant 0 : i32
    %c0_i32_0 = arith.constant 0 : i32
    return %arg0, %0, %c0_i32 : i32, i32, i32
  }
  func.func @transform_2(%arg0: i32, %arg1: i32) -> (i32, i32, i32) {
    %c0_i32 = arith.constant 0 : i32
    %c0_i32_0 = arith.constant 0 : i32
    %c0_i32_1 = arith.constant 0 : i32
    %c0_i32_2 = arith.constant 0 : i32
    return %c0_i32, %c0_i32_0, %c0_i32_1 : i32, i32, i32
  }
  func.func @transform_3(%arg0: i32, %arg1: i32) -> (i32, i32) {
    %c0_i32 = arith.constant 0 : i32
    %c0_i32_0 = arith.constant 0 : i32
    return %arg1, %c0_i32 : i32, i32
  }
  func.func @transform_4(%arg0: i32, %arg1: i32) -> (i32, i32, i32) {
    %c0_i32 = arith.constant 0 : i32
    %c0_i32_0 = arith.constant 0 : i32
    return %arg0, %arg1, %c0_i32 : i32, i32, i32
  }
  func.func @transform_5(%arg0: i32, %arg1: i32) -> (i32, i32, i32, i32) {
    %c0_i32 = arith.constant 0 : i32
    %c0_i32_0 = arith.constant 0 : i32
    %c0_i32_1 = arith.constant 0 : i32
    return %arg0, %arg1, %c0_i32, %c0_i32_0 : i32, i32, i32, i32
  }
}

module attributes {stable_mosaic.version = 11 : i64} {
  func.func @_bn_relu_kernel(%arg0: i32, %arg1: memref<256x128xbf16, #tpu.memory_space<vmem>>, %arg2: memref<1x128xf32, #tpu.memory_space<vmem>>, %arg3: memref<1x128xf32, #tpu.memory_space<vmem>>, %arg4: memref<256x128xf32, #tpu.memory_space<vmem>>) attributes {dimension_semantics = [#tpu.dimension_semantics<parallel>], iteration_bounds = array<i64: 3>, scalar_prefetch = 0 : i64, scratch_operands = 0 : i64, tpu.core_type = #tpu.core_type<tc>, window_params = [{transform_indices = @transform_0, window_bounds = array<i64: 256, 128>}, {pipeline_mode = #tpu.pipeline_mode<synchronous>, transform_indices = @transform_1, window_bounds = array<i64: 1, 128>}, {pipeline_mode = #tpu.pipeline_mode<synchronous>, transform_indices = @transform_2, window_bounds = array<i64: 1, 128>}, {transform_indices = @transform_3, window_bounds = array<i64: 256, 128>}]} {
    %c0 = arith.constant 0 : index
    %c0_0 = arith.constant 0 : index
    %0 = vector.load %arg1[%c0, %c0_0] : memref<256x128xbf16, #tpu.memory_space<vmem>>, vector<256x128xbf16>
    %1 = arith.extf %0 : vector<256x128xbf16> to vector<256x128xf32>
    %c0_1 = arith.constant 0 : index
    %c0_2 = arith.constant 0 : index
    %2 = vector.load %arg2[%c0_1, %c0_2] : memref<1x128xf32, #tpu.memory_space<vmem>>, vector<1x128xf32>
    %3 = vector.broadcast %2 : vector<1x128xf32> to vector<256x128xf32>
    %4 = arith.mulf %1, %3 : vector<256x128xf32>
    %c0_3 = arith.constant 0 : index
    %c0_4 = arith.constant 0 : index
    %5 = vector.load %arg3[%c0_3, %c0_4] : memref<1x128xf32, #tpu.memory_space<vmem>>, vector<1x128xf32>
    %6 = vector.broadcast %5 : vector<1x128xf32> to vector<256x128xf32>
    %7 = arith.addf %4, %6 : vector<256x128xf32>
    %cst = arith.constant 0.000000e+00 : f32
    %8 = vector.broadcast %cst : f32 to vector<256x128xf32>
    %9 = arith.maximumf %7, %8 : vector<256x128xf32>
    %c0_5 = arith.constant 0 : index
    %c0_6 = arith.constant 0 : index
    %10 = vector.load %arg4[%c0_5, %c0_6] : memref<256x128xf32, #tpu.memory_space<vmem>>, vector<256x128xf32>
    tpu.vector_store %arg4[%c0_5, %c0_6], %9 {strides = array<i32>} : memref<256x128xf32, #tpu.memory_space<vmem>>, vector<256x128xf32>,
    return
  }
  func.func @transform_0(%arg0: i32) -> (i32, i32) {
    %c0_i32 = arith.constant 0 : i32
    %c0_i32_0 = arith.constant 0 : i32
    return %arg0, %c0_i32 : i32, i32
  }
  func.func @transform_1(%arg0: i32) -> (i32, i32) {
    %c0_i32 = arith.constant 0 : i32
    %c0_i32_0 = arith.constant 0 : i32
    %c0_i32_1 = arith.constant 0 : i32
    return %c0_i32, %c0_i32_0 : i32, i32
  }
  func.func @transform_2(%arg0: i32) -> (i32, i32) {
    %c0_i32 = arith.constant 0 : i32
    %c0_i32_0 = arith.constant 0 : i32
    %c0_i32_1 = arith.constant 0 : i32
    return %c0_i32, %c0_i32_0 : i32, i32
  }
  func.func @transform_3(%arg0: i32) -> (i32, i32) {
    %c0_i32 = arith.constant 0 : i32
    %c0_i32_0 = arith.constant 0 : i32
    return %arg0, %c0_i32 : i32, i32
  }
}

</mosaic_0001>

<bundles_post_ra>
// kernel: conv_bn_relu.3
= control target key start
LH: loop header
LB: loop body
LE: loop exit
PB: predicated region body
PF: predicated region fallthrough
CT: control target
= control target key end

     0   :  { %s564_s12 = smov 0   ;;  %s711_s0 = inlined_call_operand.vmem [shape: bf16[768,128], index: 0, kind: input, shape index: {}]   ;;  %s712_s1 = inlined_call_operand.vmem [shape: f32[1,128], index: 1, kind: input, shape index: {}]   ;;  %s713_s2 = inlined_call_operand.vmem [shape: f32[1,128], index: 2, kind: input, shape index: {}]   ;;  %s714_s3 = inlined_call_operand.vmem [shape: f32[768,128], index: 3, kind: output, shape index: {}]  }
   0x1 LB: > { %s436_s13 = sadd.s32 4294967295, %s542_s12   ;;  %p440_p0 = scmp.ge.s32.totalorder %s542_s12, 1  ;;  %s542_s12 = sphi %s564_s12, %s13_s12  }
   0x2   : > { %p138_p1 = scmp.lt.s32.totalorder %s542_s12, 4 }
   0x4   : > { %p139_p2 = pnand %p440_p0, %p138_p1 }
   0x5   : > { %s441_s14 = sshll.u32 (!%p139_p2), %s436_s13, 5 }
   0x6   : > { %142 = sbr.rel (%p139_p2) target bundleno = 51 (0x33), region = 32  ;;  %p163_p3 = scmp.lt.s32.totalorder (!%p139_p2), %s441_s14, 95 }
   0xb   : > { %s716_s14 = smov (!%p163_p3, %s441_s14), 95  ;;  %v583_v0 = vld [vmem:[%s712_s1] ss:$0 sm:$0xff] }
   0xc   : > { %s442_s15 = sshll.u32 %s716_s14, 2  ;;  %v592_v9 = vld [vmem:[%s713_s2] ss:$0 sm:$0xff]  ;;  %s444_s23 = sshll.u32 %s716_s14, 3 }
   0xd   : > { %s578_s18 = scalar_lea.vmem %s711_s0, %s442_s15  ;;  %s610_s26 = scalar_lea.vmem %s714_s3, %s444_s23 }
   0xe   : > { %v450_v1 = vld [vmem:[%s578_s18] sm:$0xff]   ;;  %v513_v2 = vld [vmem:[%s578_s18 + $0x8] sm:$0xff]   ;;  %v514_v3 = vld [vmem:[%s578_s18 + $0x10] sm:$0xff]  }
   0xf   : > { %v451_v4 = vunpack.c.l.bf16 %v450_v1  ;;  %v452_v5 = vunpack.c.h.bf16 %v450_v1  ;;  %v455_v6 = vunpack.c.l.bf16 %v513_v2  ;;  %v456_v7 = vunpack.c.h.bf16 %v513_v2  ;;  %v515_v8 = vld [vmem:[%s578_s18 + $0x18] sm:$0xff]   ;;  %v516_v30 = vld [vmem:[%s578_s18 + $0x20] sm:$0xff]   ;;  %v517_v31 = vld [vmem:[%s578_s18 + $0x28] sm:$0xff]  }
  0x10   : > { %v459_v10 = vunpack.c.l.bf16 %v514_v3  ;;  %v460_v11 = vunpack.c.h.bf16 %v514_v3  ;;  %v463_v12 = vunpack.c.l.bf16 %v515_v8  ;;  %v464_v13 = vunpack.c.h.bf16 %v515_v8  ;;  %v518_v36 = vld [vmem:[%s578_s18 + $0x30] sm:$0xff]   ;;  %v519_v37 = vld [vmem:[%s578_s18 + $0x38] sm:$0xff]   ;;  %v520_v3 = vld [vmem:[%s578_s18 + $0x40] sm:$0xff]  }
  0x11   : > { %v245_v14 = vmul.f32 %v451_v4, %v583_v0  ;;  %v246_v15 = vmul.f32 %v452_v5, %v583_v0  ;;  %v247_v16 = vmul.f32 %v455_v6, %v583_v0  ;;  %v248_v17 = vmul.f32 %v456_v7, %v583_v0  ;;  %v521_v4 = vld [vmem:[%s578_s18 + $0x48] sm:$0xff]  }
  0x12   : > { %v249_v18 = vmul.f32 %v459_v10, %v583_v0  ;;  %v250_v19 = vmul.f32 %v460_v11, %v583_v0  ;;  %v251_v20 = vmul.f32 %v463_v12, %v583_v0  ;;  %v252_v21 = vmul.f32 %v464_v13, %v583_v0  ;;  %v522_v10 = vld [vmem:[%s578_s18 + $0x50] sm:$0xff]   ;;  %v523_v11 = vld [vmem:[%s578_s18 + $0x58] sm:$0xff]  }
  0x13   : > { %v284_v22 = vadd.f32 %v592_v9, %v245_v14  ;;  %v285_v23 = vadd.f32 %v592_v9, %v246_v15  ;;  %v286_v24 = vadd.f32 %v592_v9, %v247_v16  ;;  %v287_v25 = vadd.f32 %v592_v9, %v248_v17 }
  0x14   : > { %v288_v26 = vadd.f32 %v592_v9, %v249_v18  ;;  %v289_v27 = vadd.f32 %v592_v9, %v250_v19  ;;  %v290_v28 = vadd.f32 %v592_v9, %v251_v20  ;;  %v291_v29 = vadd.f32 %v592_v9, %v252_v21 }
  0x15   : > { %v316_v32 = vmax.f32 %v284_v22, 0.0  ;;  %v317_v33 = vmax.f32 %v285_v23, 0.0  ;;  %v318_v34 = vmax.f32 %v286_v24, 0.0  ;;  %v319_v35 = vmax.f32 %v287_v25, 0.0 }
  0x16   : > { %v320_v38 = vmax.f32 %v288_v26, 0.0  ;;  %v321_v39 = vmax.f32 %v289_v27, 0.0  ;;  %v322_v40 = vmax.f32 %v290_v28, 0.0  ;;  %v323_v41 = vmax.f32 %v291_v29, 0.0 }
  0x17   : > { %348 = vst [vmem:[%s610_s26] sm:$0xff] %v316_v32  ;;  %349 = vst [vmem:[%s610_s26 + $0x8] sm:$0xff] %v317_v33  ;;  %v467_v42 = vunpack.c.l.bf16 %v516_v30  ;;  %v468_v43 = vunpack.c.h.bf16 %v516_v30  ;;  %v471_v44 = vunpack.c.l.bf16 %v517_v31  ;;  %v472_v45 = vunpack.c.h.bf16 %v517_v31 }
  0x18   : > { %350 = vst [vmem:[%s610_s26 + $0x10] sm:$0xff] %v318_v34  ;;  %351 = vst [vmem:[%s610_s26 + $0x18] sm:$0xff] %v319_v35  ;;  %v475_v46 = vunpack.c.l.bf16 %v518_v36  ;;  %v476_v47 = vunpack.c.h.bf16 %v518_v36  ;;  %v479_v48 = vunpack.c.l.bf16 %v519_v37  ;;  %v480_v49 = vunpack.c.h.bf16 %v519_v37 }
  0x19   : > { %352 = vst [vmem:[%s610_s26 + $0x20] sm:$0xff] %v320_v38  ;;  %353 = vst [vmem:[%s610_s26 + $0x28] sm:$0xff] %v321_v39  ;;  %v253_v50 = vmul.f32 %v467_v42, %v583_v0  ;;  %v254_v51 = vmul.f32 %v468_v43, %v583_v0  ;;  %v255_v52 = vmul.f32 %v471_v44, %v583_v0  ;;  %v483_v16 = vunpack.c.l.bf16 %v520_v3 }
  0x1a   : > { %354 = vst [vmem:[%s610_s26 + $0x30] sm:$0xff] %v322_v40  ;;  %355 = vst [vmem:[%s610_s26 + $0x38] sm:$0xff] %v323_v41  ;;  %v256_v53 = vmul.f32 %v472_v45, %v583_v0  ;;  %v257_v54 = vmul.f32 %v475_v46, %v583_v0  ;;  %v258_v55 = vmul.f32 %v476_v47, %v583_v0  ;;  %v484_v17 = vunpack.c.h.bf16 %v520_v3  ;;  %v524_v40 = vld [vmem:[%s578_s18 + $0x60] sm:$0xff]   ;;  %v525_v41 = vld [vmem:[%s578_s18 + $0x68] sm:$0xff]  }
  0x1b   : > { %v259_v56 = vmul.f32 %v479_v48, %v583_v0  ;;  %v260_v57 = vmul.f32 %v480_v49, %v583_v0  ;;  %v292_v58 = vadd.f32 %v592_v9, %v253_v50  ;;  %v293_v59 = vadd.f32 %v592_v9, %v254_v51  ;;  %v526_v46 = vld [vmem:[%s578_s18 + $0x70] sm:$0xff]   ;;  %v527_v47 = vld [vmem:[%s578_s18 + $0x78] sm:$0xff]  }
  0x1c   : > { %v294_v60 = vadd.f32 %v592_v9, %v255_v52  ;;  %v295_v61 = vadd.f32 %v592_v9, %v256_v53  ;;  %v296_v62 = vadd.f32 %v592_v9, %v257_v54  ;;  %v297_v63 = vadd.f32 %v592_v9, %v258_v55 }
  0x1d   : > { %v298_v1 = vadd.f32 %v592_v9, %v259_v56  ;;  %v299_v2 = vadd.f32 %v592_v9, %v260_v57  ;;  %v324_v5 = vmax.f32 %v292_v58, 0.0  ;;  %v325_v6 = vmax.f32 %v293_v59, 0.0 }
  0x1e   : > { %v326_v7 = vmax.f32 %v294_v60, 0.0  ;;  %v327_v8 = vmax.f32 %v295_v61, 0.0  ;;  %v328_v12 = vmax.f32 %v296_v62, 0.0  ;;  %v329_v13 = vmax.f32 %v297_v63, 0.0 }
  0x1f   : > { %v330_v14 = vmax.f32 %v298_v1, 0.0  ;;  %v331_v15 = vmax.f32 %v299_v2, 0.0  ;;  %356 = vst [vmem:[%s610_s26 + $0x40] sm:$0xff] %v324_v5  ;;  %357 = vst [vmem:[%s610_s26 + $0x48] sm:$0xff] %v325_v6  ;;  %v487_v18 = vunpack.c.l.bf16 %v521_v4  ;;  %v488_v19 = vunpack.c.h.bf16 %v521_v4 }
  0x20   : > { %358 = vst [vmem:[%s610_s26 + $0x50] sm:$0xff] %v326_v7  ;;  %359 = vst [vmem:[%s610_s26 + $0x58] sm:$0xff] %v327_v8  ;;  %v491_v20 = vunpack.c.l.bf16 %v522_v10  ;;  %v492_v21 = vunpack.c.h.bf16 %v522_v10  ;;  %v495_v22 = vunpack.c.l.bf16 %v523_v11  ;;  %v496_v23 = vunpack.c.h.bf16 %v523_v11 }
  0x21   : > { %360 = vst [vmem:[%s610_s26 + $0x60] sm:$0xff] %v328_v12  ;;  %361 = vst [vmem:[%s610_s26 + $0x68] sm:$0xff] %v329_v13  ;;  %v261_v24 = vmul.f32 %v483_v16, %v583_v0  ;;  %v262_v25 = vmul.f32 %v484_v17, %v583_v0  ;;  %v263_v26 = vmul.f32 %v487_v18, %v583_v0  ;;  %v499_v52 = vunpack.c.l.bf16 %v524_v40 }
  0x22   : > { %362 = vst [vmem:[%s610_s26 + $0x70] sm:$0xff] %v330_v14  ;;  %363 = vst [vmem:[%s610_s26 + $0x78] sm:$0xff] %v331_v15  ;;  %v264_v27 = vmul.f32 %v488_v19, %v583_v0  ;;  %v265_v28 = vmul.f32 %v491_v20, %v583_v0  ;;  %v266_v29 = vmul.f32 %v492_v21, %v583_v0  ;;  %v500_v53 = vunpack.c.h.bf16 %v524_v40 }
  0x23   : > { %v267_v30 = vmul.f32 %v495_v22, %v583_v0  ;;  %v268_v31 = vmul.f32 %v496_v23, %v583_v0  ;;  %v300_v32 = vadd.f32 %v592_v9, %v261_v24  ;;  %v301_v33 = vadd.f32 %v592_v9, %v262_v25 }
  0x24   : > { %v302_v34 = vadd.f32 %v592_v9, %v263_v26  ;;  %v303_v35 = vadd.f32 %v592_v9, %v264_v27  ;;  %v304_v36 = vadd.f32 %v592_v9, %v265_v28  ;;  %v305_v37 = vadd.f32 %v592_v9, %v266_v29 }
  0x25   : > { %v306_v38 = vadd.f32 %v592_v9, %v267_v30  ;;  %v307_v39 = vadd.f32 %v592_v9, %v268_v31  ;;  %v332_v42 = vmax.f32 %v300_v32, 0.0  ;;  %v333_v43 = vmax.f32 %v301_v33, 0.0 }
  0x26   : > { %v334_v44 = vmax.f32 %v302_v34, 0.0  ;;  %v335_v45 = vmax.f32 %v303_v35, 0.0  ;;  %v336_v48 = vmax.f32 %v304_v36, 0.0  ;;  %v337_v49 = vmax.f32 %v305_v37, 0.0 }
  0x27   : > { %v338_v50 = vmax.f32 %v306_v38, 0.0  ;;  %v339_v51 = vmax.f32 %v307_v39, 0.0  ;;  %364 = vst [vmem:[%s610_s26 + $0x80] sm:$0xff] %v332_v42  ;;  %365 = vst [vmem:[%s610_s26 + $0x88] sm:$0xff] %v333_v43  ;;  %v503_v54 = vunpack.c.l.bf16 %v525_v41  ;;  %v504_v55 = vunpack.c.h.bf16 %v525_v41 }
  0x28   : > { %366 = vst [vmem:[%s610_s26 + $0x90] sm:$0xff] %v334_v44  ;;  %367 = vst [vmem:[%s610_s26 + $0x98] sm:$0xff] %v335_v45  ;;  %v507_v56 = vunpack.c.l.bf16 %v526_v46  ;;  %v508_v57 = vunpack.c.h.bf16 %v526_v46  ;;  %v511_v58 = vunpack.c.l.bf16 %v527_v47  ;;  %v512_v59 = vunpack.c.h.bf16 %v527_v47 }
  0x29   : > { %368 = vst [vmem:[%s610_s26 + $0xa0] sm:$0xff] %v336_v48  ;;  %369 = vst [vmem:[%s610_s26 + $0xa8] sm:$0xff] %v337_v49  ;;  %v269_v60 = vmul.f32 %v499_v52, %v583_v0  ;;  %v270_v61 = vmul.f32 %v500_v53, %v583_v0  ;;  %v271_v62 = vmul.f32 %v503_v54, %v583_v0 }
  0x2a   : > { %370 = vst [vmem:[%s610_s26 + $0xb0] sm:$0xff] %v338_v50  ;;  %371 = vst [vmem:[%s610_s26 + $0xb8] sm:$0xff] %v339_v51  ;;  %v272_v63 = vmul.f32 %v504_v55, %v583_v0  ;;  %v273_v1 = vmul.f32 %v507_v56, %v583_v0  ;;  %v274_v2 = vmul.f32 %v508_v57, %v583_v0 }
  0x2b   : > { %v275_v3 = vmul.f32 %v511_v58, %v583_v0  ;;  %v276_v4 = vmul.f32 %v512_v59, %v583_v0  ;;  %v308_v5 = vadd.f32 %v592_v9, %v269_v60  ;;  %v309_v6 = vadd.f32 %v592_v9, %v270_v61 }
  0x2c   : > { %v310_v7 = vadd.f32 %v592_v9, %v271_v62  ;;  %v311_v8 = vadd.f32 %v592_v9, %v272_v63  ;;  %v312_v10 = vadd.f32 %v592_v9, %v273_v1  ;;  %v313_v11 = vadd.f32 %v592_v9, %v274_v2 }
  0x2d   : > { %v314_v0 = vadd.f32 %v592_v9, %v275_v3  ;;  %v315_v12 = vadd.f32 %v592_v9, %v276_v4  ;;  %v340_v13 = vmax.f32 %v308_v5, 0.0  ;;  %v341_v14 = vmax.f32 %v309_v6, 0.0 }
  0x2e   : > { %v342_v15 = vmax.f32 %v310_v7, 0.0  ;;  %v343_v16 = vmax.f32 %v311_v8, 0.0  ;;  %v344_v17 = vmax.f32 %v312_v10, 0.0  ;;  %v345_v18 = vmax.f32 %v313_v11, 0.0 }
  0x2f   : > { %v346_v19 = vmax.f32 %v314_v0, 0.0  ;;  %v347_v20 = vmax.f32 %v315_v12, 0.0  ;;  %372 = vst [vmem:[%s610_s26 + $0xc0] sm:$0xff] %v340_v13  ;;  %373 = vst [vmem:[%s610_s26 + $0xc8] sm:$0xff] %v341_v14 }
  0x30   : > { %374 = vst [vmem:[%s610_s26 + $0xd0] sm:$0xff] %v342_v15  ;;  %375 = vst [vmem:[%s610_s26 + $0xd8] sm:$0xff] %v343_v16 }
  0x31   : > { %376 = vst [vmem:[%s610_s26 + $0xe0] sm:$0xff] %v344_v17  ;;  %377 = vst [vmem:[%s610_s26 + $0xe8] sm:$0xff] %v345_v18 }
  0x32   : > { %378 = vst [vmem:[%s610_s26 + $0xf0] sm:$0xff] %v346_v19  ;;  %379 = vst [vmem:[%s610_s26 + $0xf8] sm:$0xff] %v347_v20 }
  0x33 PF: > { %s13_s12 = sadd.s32 1, %s542_s12  }
  0x34   : > { %p10_p4 = scmp.ge.s32.totalorder %s13_s12, 5  }
  0x36   :  { %12 = sbr.rel (!%p10_p4) target bundleno = 1 (0x1), region = 62 }

// kernel: conv_bn_relu.2
= control target key start
LH: loop header
LB: loop body
LE: loop exit
PB: predicated region body
PF: predicated region fallthrough
CT: control target
= control target key end

     0   :  { %s2794_s18 = smov 0   ;;  %s2796_s19 = smov 0   ;;  %s3626_s0 = inlined_call_operand.vmem [shape: f32[2,512,8], index: 0, kind: input, shape index: {}, may-alias: {0,1}]   ;;  %s3627_s1 = inlined_call_operand.vmem [shape: f32[2,512,8], index: 1, kind: input, shape index: {}, may-alias: {0,1}]   ;;  %s3628_s2 = inlined_call_operand.vmem [shape: bf16[9,8,128], index: 2, kind: input, shape index: {}]   ;;  %s3629_s3 = inlined_call_operand.vmem [shape: f32[384,1], index: 3, kind: input, shape index: {}]   ;;  %s3630_s4 = inlined_call_operand.vmem [shape: bf16[2,384,128], index: 4, kind: output, shape index: {0}]   ;;  %s3631_s5 = inlined_call_operand.vmem [shape: f32[2,3,2,128], index: 5, kind: output, shape index: {1}]  }
   0x1   :  { %s2798_s20 = smov 0   ;;  %s2800_s21 = smov 0  }
   0x2   :  { %s2802_s22 = smov 0  }
   0x3 LB: > { %s25_s23 = sadd.s32 1, %s2753_s20  ;;  %s28_s24 = sadd.s32 1, %s2757_s21  ;;  %s2761_s22 = sphi %s2802_s22, %s16_s22   ;;  %s2757_s21 = sphi %s2800_s21, %s3679_s21   ;;  %s2753_s20 = sphi %s2798_s20, %s3678_s20   ;;  %s2749_s19 = sphi %s2796_s19, %s3677_s19   ;;  %s2745_s18 = sphi %s2794_s18, %s3676_s18  }
   0x4   : > { %p26_p0 = scmp.ge.s32.totalorder %s25_s23, 3  ;;  %p2248_p1 = scmp.ge.s32.totalorder %s2761_s22, 1 }
   0x5   : > { %p245_p2 = scmp.lt.s32.totalorder %s2761_s22, 7 }
   0x6   : > { %s3681_s23 = smov (%p26_p0, %s25_s23), 0  ;;  %s3683_s24 = smov (!%p26_p0, %s28_s24), %s2757_s21 }
   0x7   : > { %p246_p3 = pnand %p2248_p1, %p245_p2  ;;  %p30_p4 = scmp.ge.s32.totalorder %s3683_s24, 2 }
   0x9   : > { %s3685_s24 = smov (%p30_p4, %s3683_s24), 0  ;;  %249 = sbr.rel (%p246_p3) target bundleno = 400 (0x190), region = 36 }
   0xe   : > { %v2260_v0 = vld [vmem:[%s3628_s2 + $0x4] sm:$0xf]  ;;  %vm478_vm0 = vcmask 1043456   ;;  %s2830_s27 = sshll.u32 %s2745_s18, 4  ;;  %p305_p5 = scmp.lt.s32.totalorder %s2749_s19, 1  ;;  %vm453_vm1 = vcmask 64512  }
   0xf   : > { %2669 = vmatprep.subr.msk.bf16.mxu1 %vm478_vm0, %v2260_v0  ;;  %2668 = vmatprep.subr.msk.bf16.mxu0 %vm478_vm0, %v2260_v0  ;;  %v480_v1 = vsel %vm478_vm0, %v2260_v0, 0  ;;  %p307_p6 = scmp.lt.s32.totalorder %s2830_s27, 63  ;;  %v380_v2 = vld [vmem:[%s3628_s2] sm:$0xf]  ;;  %v2277_v3 = vld [vmem:[%s3628_s2 + $0x8] sm:$0xf] }
  0x10   : > { %2667 = vmatpush3.bf16.msra.mxu1 %v480_v1  ;;  %2505 = vmatpush3.bf16.msra.mxu0 %v480_v1  ;;  %s3687_s19 = smov (!%p305_p5, %s2749_s19), 1  ;;  %s2359_s9 = sadd.s32 16, %s2830_s27  ;;  %vm384_vm2 = vsmask.f32 7424  ;;  %v596_v34 = vsel %vm478_vm0, %v380_v2, 0  ;;  %v749_v35 = vsel %vm478_vm0, %v2277_v3, 0 }
  0x11   : > { %s308_s7 = scalar_select %p307_p6, %s2830_s27, 63  ;;  %2670 = vmatprep.subr.msk.bf16.mxu1 %vm478_vm0, %v380_v2  ;;  %2671 = vmatprep.subr.msk.bf16.mxu0 %vm478_vm0, %v2277_v3  ;;  %v2295_v59 = vld [vmem:[%s3628_s2 + $0x10] sm:$0xf]  ;;  %v2286_v3 = vld [vmem:[%s3628_s2 + $0xc] sm:$0xf]  ;;  %vm706_vm3 = vcmask 1046528  }
  0x12   : > { %s2250_s8 = sshll.u32 %s3687_s19, 6  ;;  %p318_p7 = scmp.lt.s32.totalorder %s2359_s9, 63  ;;  %vm1186_vm4 = vcmask 1045504   ;;  %vm1666_vm5 = vcmask 1044480   ;;  %vm1478_vm6 = vsmask.f32 5376 }
  0x13   : > { %s310_s10 = sadd.s32 %s2250_s8, %s308_s7  ;;  %p327_p8 = scmp.lt.s32.totalorder %s2830_s27, 47  ;;  %vm998_vm7 = vsmask.f32 6400  ;;  %vm2074_vm8 = vcmask 1040384  }
  0x14   : > { %s2251_s11 = sshll.u32 %s310_s10, 3  ;;  %s3689_s9 = smov (!%p318_p7, %s2359_s9), 63 }
  0x15   : > { %s2852_s14 = scalar_lea.vmem %s3626_s0, %s2251_s11  ;;  %s321_s15 = sadd.s32 %s2250_s8, %s3689_s9 }
  0x16   : > { %v351_v4 = vld [vmem:[%s2852_s14] sm:$0xff]  ;;  %v352_v5 = vld [vmem:[%s2852_s14 + $0x8] sm:$0xff]  ;;  %v353_v6 = vld [vmem:[%s2852_s14 + $0x10] sm:$0xff]  ;;  %s2254_s16 = sshll.u32 %s321_s15, 3  ;;  %s3691_s27 = smov (!%p327_p8, %s2830_s27), 47 }
  0x17   : > { %v354_v7 = vld [vmem:[%s2852_s14 + $0x18] sm:$0xff]  ;;  %v2858_v8 = vpack.c.bf16 %v352_v5, %v351_v4  ;;  %v359_v9 = vld [vmem:[%s2852_s14 + $0x40] sm:$0xff]  ;;  %v360_v10 = vld [vmem:[%s2852_s14 + $0x48] sm:$0xff]  ;;  %s2902_s26 = scalar_lea.vmem %s3627_s1, %s2254_s16  ;;  %s2256_s11 = sshll.u32 %s3691_s27, 3 }
  0x18   : > { %v2862_v11 = vpack.c.bf16 %v354_v7, %v353_v6  ;;  %v361_v12 = vld [vmem:[%s2852_s14 + $0x50] sm:$0xff]  ;;  %v362_v13 = vld [vmem:[%s2852_s14 + $0x58] sm:$0xff]  ;;  %v2866_v14 = vpack.c.bf16 %v360_v10, %v359_v9  ;;  %v355_v15 = vld [vmem:[%s2852_s14 + $0x20] sm:$0xff]  ;;  %p344_p9 = scmp.lt.s32.totalorder %s2745_s18, 2  ;;  %s2679_s7 = smul.u32 3, %s3687_s19 }
  0x19   : > { %v386_v16 = vshrl.u32 %v2858_v8, 16  ;;  %v388_v17 = vshll.u32 %v2858_v8, 16  ;;  %v2871_v18 = vpack.c.bf16 %v362_v13, %v361_v12  ;;  %v356_v19 = vld [vmem:[%s2852_s14 + $0x28] sm:$0xff]  ;;  %v363_v24 = vld [vmem:[%s2852_s14 + $0x60] sm:$0xff]  ;;  %v357_v30 = vld [vmem:[%s2852_s14 + $0x30] sm:$0xff]  ;;  %v707_v2 = vrot.slane %v2858_v8, 1 }
  0x1a   : > { %v393_v20 = vshll.u32 %v2862_v11, 16  ;;  %v397_v21 = vshrl.u32 %v2862_v11, 16  ;;  %v2877_v22 = vshll.u32 %v2866_v14, 16  ;;  %v2880_v23 = vshrl.u32 %v2866_v14, 16  ;;  %v364_v25 = vld [vmem:[%s2852_s14 + $0x68] sm:$0xff]  ;;  %v358_v31 = vld [vmem:[%s2852_s14 + $0x38] sm:$0xff] }
  0x1b   : > { %v390_v26 = vrot.slane %v388_v17, 1  ;;  %v2885_v27 = vshll.u32 %v2871_v18, 16  ;;  %v2888_v28 = vshrl.u32 %v2871_v18, 16  ;;  %v2890_v29 = vpack.c.bf16 %v356_v19, %v355_v15  ;;  %v365_v40 = vld [vmem:[%s2852_s14 + $0x70] sm:$0xff]  ;;  %v366_v41 = vld [vmem:[%s2852_s14 + $0x78] sm:$0xff]  ;;  %v367_v50 = vld [vmem:[%s2902_s26] sm:$0xff]  ;;  %s3152_s14 = scalar_lea.vmem %s3629_s3, %s2256_s11 }
  0x1c   : > { %v395_v32 = vrot.slane %v393_v20, 1  ;;  %v419_v33 = vrot.slane %v2877_v22, 1  ;;  %v2908_v39 = vpack.c.bf16 %v364_v25, %v363_v24  ;;  %v2915_v44 = vpack.c.bf16 %v358_v31, %v357_v30  ;;  %s3693_s18 = smov (!%p344_p9, %s2745_s18), 2 }
  0x1d   : > { %v391_v36 = vor.u32 %v390_v26, %v386_v16  ;;  %v427_v37 = vrot.slane %v2885_v27, 1  ;;  %v2906_v38 = vshll.u32 %v2890_v29, 16  ;;  %v2918_v45 = vshrl.u32 %v2890_v29, 16  ;;  %v368_v26 = vld [vmem:[%s2902_s26 + $0x8] sm:$0xff]  ;;  %s347_s8 = sadd.s32 %s2679_s7, %s3693_s18 }
  0x1e   : > { %v399_v42 = vor.u32 %v397_v21, %v395_v32  ;;  %v423_v43 = vor.u32 %v2880_v23, %v419_v33  ;;  %v2924_v49 = vshll.u32 %v2908_v39, 16  ;;  %v2930_v52 = vshll.u32 %v2915_v44, 16  ;;  %s2259_s9 = sshll.u32 %s347_s8, 1 }
  0x1f   : > { %v396_v46 = vsel %vm384_vm2, %v391_v36, %v395_v32  ;;  %v431_v47 = vor.u32 %v2888_v28, %v427_v37  ;;  %v403_v48 = vrot.slane %v2906_v38, 1  ;;  %v2932_v53 = vpack.c.bf16 %v366_v41, %v365_v40  ;;  %s349_s12 = scalar_lea.vmem %s3631_s5, %s2259_s9 }
  0x20   : > { %2506 = vmatprep.mubr.msk.bf16.mxu0 %vm453_vm1, %v396_v46  ;;  %v428_v51 = vsel %vm384_vm2, %v423_v43, %v427_v37  ;;  %v2935_v54 = vshrl.u32 %v2908_v39, 16  ;;  %v435_v56 = vrot.slane %v2924_v49, 1  ;;  %v2942_v58 = vshrl.u32 %v2915_v44, 16 }
  0x21   : > { %2514 = vmatprep.mubr.msk.bf16.mxu1 %vm453_vm1, %v428_v51  ;;  %v404_v55 = vsel %vm384_vm2, %v399_v42, %v403_v48  ;;  %v407_v57 = vor.u32 %v2918_v45, %v403_v48  ;;  %v411_v60 = vrot.slane %v2930_v52, 1  ;;  %v2950_v61 = vshll.u32 %v2932_v53, 16 }
  0x22   : > { %2507 = vmatmul.mubr.msk.bf16.vlgmr.msra.gmra.mxu0 %vm453_vm1, %v404_v55  ;;  %v2952_v62 = vpack.c.bf16 %v367_v50, %v367_v50  ;;  %v2955_v63 = vshrl.u32 %v2932_v53, 16  ;;  %v436_v0 = vsel %vm384_vm2, %v431_v47, %v435_v56  ;;  %v439_v1 = vor.u32 %v2935_v54, %v435_v56 }
  0x23   : > { %2541 = vmatpush3.bf16.msra.mxu0 %v749_v35  ;;  %2515 = vmatmul.mubr.msk.bf16.vlgmr.msra.gmra.mxu1 %vm453_vm1, %v436_v0  ;;  %v412_v4 = vsel %vm384_vm2, %v407_v57, %v411_v60  ;;  %v443_v5 = vrot.slane %v2950_v61, 1  ;;  %v415_v6 = vor.u32 %v2942_v58, %v411_v60  ;;  %v708_v9 = vrot.slane %v2862_v11, 1 }
  0x24   : > { %v449_v7 = vshll.u32 %v2952_v62, 16  ;;  %2673 = vmatprep.subr.msk.bf16.mxu0 %vm478_vm0, %v2295_v59  ;;  %2523 = vmatpush3.bf16.msra.mxu1 %v596_v34  ;;  %v710_v19 = vrot.slane %v2890_v29, 1  ;;  %v712_v24 = vrot.slane %v2915_v44, 1  ;;  %v1069_v30 = vsel %vm478_vm0, %v2295_v59, 0 }
  0x25   : > { %2510 = vmatprep.mubr.msk.bf16.mxu0 %vm453_vm1, %v412_v4  ;;  %v444_v10 = vsel %vm384_vm2, %v439_v1, %v443_v5  ;;  %v447_v12 = vor.u32 %v2955_v63, %v443_v5  ;;  %2672 = vmatprep.subr.msk.bf16.mxu1 %vm478_vm0, %v2286_v3  ;;  %v420_v15 = vsel %vm384_vm2, %v415_v6, %v419_v33  ;;  %v881_v32 = vsel %vm478_vm0, %v2286_v3, 0  ;;  %v2997_v33 = vld [vmem:[%s3628_s2 + $0x18] sm:$0xf] }
  0x26   : > { %v451_v13 = vrot.slane %v449_v7, 1  ;;  %2518 = vmatprep.mubr.msk.bf16.mxu1 %vm453_vm1, %v444_v10  ;;  %v709_v16 = vsel %vm706_vm3, %v707_v2, %v708_v9  ;;  %v2986_v25 = vsel %vm706_vm3, %v708_v9, %v710_v19  ;;  %v2991_v31 = vsel %vm706_vm3, %v710_v19, %v712_v24  ;;  %v370_v10 = vld [vmem:[%s2902_s26 + $0x18] sm:$0xff] }
  0x27   : > { %v1187_v34 = vrot.slane %v2862_v11, 2  ;;  %v1188_v35 = vrot.slane %v2890_v29, 2  ;;  %v3007_v36 = vpack.c.bf16 %v368_v26, %v367_v50  ;;  %v714_v37 = vrot.slane %v2866_v14, 1 }
  0x28   : > { %v452_v17 = vsel %vm384_vm2, %v447_v12, %v451_v13  ;;  %v716_v40 = vrot.slane %v2871_v18, 1  ;;  %v1190_v41 = vrot.slane %v2915_v44, 2  ;;  %v718_v42 = vrot.slane %v2908_v39, 1 }
  0x29   : > { %v3025_v43 = vsel %vm1186_vm4, %v1187_v34, %v1188_v35  ;;  %v1192_v46 = vrot.slane %v2866_v14, 2  ;;  %v1194_v47 = vrot.slane %v2871_v18, 2  ;;  %v3032_v48 = vrot.slane %v2932_v53, 1 }
  0x2a   : > { %2511 = vmatmul.mubr.msk.bf16.gmra.mxu0 %vm453_vm1, %v420_v15  ;;  %v3036_v50 = vrot.slane %v397_v21, 1  ;;  %v1002_v51 = vrot.slane %v2918_v45, 1  ;;  %v3040_v55 = vsel %vm1186_vm4, %v1188_v35, %v1190_v41  ;;  %v1003_v56 = vrot.slane %v2906_v38, 2 }
  0x2b   : > { %2542 = vmatprep.mubr.msk.bf16.mxu0 %vm453_vm1, %v709_v16  ;;  %2519 = vmatmul.mubr.msk.bf16.gmra.mxu1 %vm453_vm1, %v452_v17  ;;  %v3046_v57 = vsel %vm1186_vm4, %v1190_v41, %v1192_v46  ;;  %v3049_v59 = vsel %vm1186_vm4, %v1192_v46, %v1194_v47  ;;  %v1486_v21 = vrot.slane %v2880_v23, 2  ;;  %v3054_v60 = vsel %vm706_vm3, %v712_v24, %v714_v37  ;;  %v3092_v17 = vld [vmem:[%s2902_s26 + $0x10] sm:$0xff] }
  0x2c   : > { %2524 = vmatprep.mubr.msk.bf16.mxu1 %vm453_vm1, %v2858_v8  ;;  %v3001_v8 = vrot.slane %v393_v20, 2  ;;  %v3016_v20 = vld [vmem:[%s3628_s2 + $0x14] sm:$0xf]  ;;  %v3632_v0 = vrot.slane %v2932_v53, 2  ;;  %v3059_v1 = vsel %vm706_vm3, %v714_v37, %v716_v40  ;;  %v722_v2 = vrot.slane %v2952_v62, 1 }
  0x2d   : > { %v1479_v4 = vrot.slane %v2918_v45, 2  ;;  %v3067_v5 = vsel %vm706_vm3, %v716_v40, %v718_v42  ;;  %v3071_v6 = vsel %vm706_vm3, %v718_v42, %v3032_v48  ;;  %v3083_v45 = vor.u32 %v1003_v56, %v1002_v51 }
  0x2e   : > { %v1001_v7 = vor.u32 %v3001_v8, %v3036_v50  ;;  %v1027_v12 = vshrl.u32 %v3007_v36, 16  ;;  %v1480_v13 = vrot.slane %v2906_v38, 3  ;;  %v1482_v15 = vrot.slane %v2942_v58, 2  ;;  %v1909_v50 = vld [vmem:[%s3152_s14 + $0x28] sm:$0xff] }
  0x2f   : > { %v1030_v16 = vshll.u32 %v3007_v36, 16  ;;  %v1483_v19 = vrot.slane %v2930_v52, 3  ;;  %v1667_v24 = vrot.slane %v2890_v29, 3  ;;  %v1668_v26 = vrot.slane %v2915_v44, 3 }
  0x30   : > { %v3105_v38 = vpack.c.bf16 %v370_v10, %v3092_v17  ;;  %v1670_v34 = vrot.slane %v2866_v14, 3  ;;  %v1490_v37 = vrot.slane %v2888_v28, 2  ;;  %v1672_v42 = vrot.slane %v2871_v18, 3 }
  0x31   : > { %v3112_v35 = vsel %vm1666_vm5, %v1667_v24, %v1668_v26  ;;  %v1494_v46 = vrot.slane %v2935_v54, 2  ;;  %v1495_v51 = vrot.slane %v2924_v49, 3  ;;  %v1674_v56 = vrot.slane %v2908_v39, 3 }
  0x32   : > { %2543 = vmatmul.mubr.msk.bf16.vlgmr.msra.gmra.mxu0 %vm453_vm1, %v2986_v25  ;;  %v3117_v41 = vsel %vm1666_vm5, %v1668_v26, %v1670_v34  ;;  %v1499_v10 = vrot.slane %v2950_v61, 3  ;;  %v1676_v24 = vrot.slane %v2932_v53, 3  ;;  %v1010_v62 = vrot.slane %v2880_v23, 1 }
  0x33   : > { %2577 = vmatpush3.bf16.msra.mxu0 %v1069_v30  ;;  %2546 = vmatprep.mubr.msk.bf16.mxu0 %vm453_vm1, %v2991_v31  ;;  %v1481_v30 = vor.u32 %v1480_v13, %v1479_v4  ;;  %v1498_v4 = vrot.slane %v2955_v63, 2 }
  0x34   : > { %2525 = vmatmul.mubr.msk.bf16.vlgmr.msra.gmra.mxu1 %vm453_vm1, %v2862_v11  ;;  %2675 = vmatprep.subr.msk.bf16.mxu0 %vm478_vm0, %v2997_v33  ;;  %v1196_v11 = vrot.slane %v2908_v39, 2 }
  0x35   : > { %2559 = vmatpush3.bf16.msra.mxu1 %v881_v32  ;;  %2528 = vmatprep.mubr.msk.bf16.mxu1 %vm453_vm1, %v2890_v29  ;;  %v1487_v32 = vrot.slane %v2877_v22, 3  ;;  %v1484_v29 = vor.u32 %v1483_v19, %v1482_v15  ;;  %v1496_v15 = vor.u32 %v1495_v51, %v1494_v46  ;;  %v3139_v19 = vsel %vm1666_vm5, %v1672_v42, %v1674_v56 }
  0x36   : > { %2674 = vmatprep.subr.msk.bf16.mxu1 %vm478_vm0, %v3016_v20  ;;  %v3063_v3 = vsel %vm1186_vm4, %v1194_v47, %v1196_v11  ;;  %v3078_v9 = vsel %vm1186_vm4, %v1196_v11, %v3632_v0  ;;  %v1500_v26 = vor.u32 %v1499_v10, %v1498_v4  ;;  %v1904_v10 = vld [vmem:[%s3152_s14] sm:$0xff]  ;;  %v1906_v0 = vld [vmem:[%s3152_s14 + $0x10] sm:$0xff] }
  0x37   : > { %v1488_v40 = vor.u32 %v1487_v32, %v1486_v21  ;;  %v3122_v47 = vsel %vm1478_vm6, %v1481_v30, %v1484_v29  ;;  %v3131_v21 = vsel %vm1666_vm5, %v1670_v34, %v1672_v42  ;;  %v1502_v30 = vrot.slane %v1027_v12, 2 }
  0x38   : > { %v1503_v32 = vrot.slane %v1030_v16, 3  ;;  %v1678_v34 = vrot.slane %v3007_v36, 3  ;;  %v3167_v42 = vsel %vm1478_vm6, %v1496_v15, %v1500_v26 }
  0x39   : > { %v3128_v11 = vsel %vm1478_vm6, %v1484_v29, %v1488_v40 }
  0x3a   : > { %2547 = vmatmul.mubr.msk.bf16.gmra.mxu0 %vm453_vm1, %v3054_v60  ;;  %v1504_v46 = vor.u32 %v1503_v32, %v1502_v30  ;;  %v3170_v51 = vsel %vm1666_vm5, %v1676_v24, %v1678_v34  ;;  %v1007_v30 = vrot.slane %v2930_v52, 2 }
  0x3b   : > { %2550 = vmatprep.mubr.msk.bf16.mxu0 %vm453_vm1, %v3059_v1 }
  0x3c   : > { %2529 = vmatmul.mubr.msk.bf16.gmra.mxu1 %vm453_vm1, %v2915_v44  ;;  %v1491_v44 = vrot.slane %v2885_v27, 3 }
  0x3d   : > { %2532 = vmatprep.mubr.msk.bf16.mxu1 %vm453_vm1, %v2866_v14 }
  0x3e   : > { %v1492_v14 = vor.u32 %v1491_v44, %v1490_v37  ;;  %v3160_v37 = vsel %vm1666_vm5, %v1674_v56, %v1676_v24  ;;  %v1507_v44 = vshrl.u32 %v3105_v38, 16  ;;  %v1006_v24 = vrot.slane %v2942_v58, 1  ;;  %v1905_v58 = vld [vmem:[%s3152_s14 + $0x8] sm:$0xff] }
  0x40   : > { %v3136_v13 = vsel %vm1478_vm6, %v1488_v40, %v1492_v14  ;;  %v3157_v29 = vsel %vm1478_vm6, %v1492_v14, %v1496_v15  ;;  %v1510_v40 = vshll.u32 %v3105_v38, 16  ;;  %v1680_v14 = vrot.slane %v3105_v38, 3 }
  0x41   : > { %v1509_v56 = vrot.slane %v1507_v44, 2  ;;  %v2763_v44 = vmov 0   ;;  %v1008_v8 = vor.u32 %v1007_v30, %v1006_v24  ;;  %v3249_v24 = vpack.c.bf16 %v3092_v17, %v3092_v17  ;;  %v1912_v30 = vld [vmem:[%s3152_s14 + $0x40] sm:$0xff] }
  0x42   : > { %2551 = vmatmul.mubr.msk.bf16.gmra.mxu0 %vm453_vm1, %v3067_v5  ;;  %v1512_v4 = vrot.slane %v1510_v40, 3  ;;  %v3183_v15 = vsel %vm1666_vm5, %v1678_v34, %v1680_v14  ;;  %2721 = vset.pattern.permute.xlu0 %v2763_v44  ;;  %v1907_v34 = vld [vmem:[%s3152_s14 + $0x18] sm:$0xff]  ;;  %v1015_v40 = vrot.slane %v2885_v27, 2  ;;  %v1229_v27 = vsel %vm478_vm0, %v3016_v20, 0 }
  0x43   : > { %2554 = vmatprep.mubr.msk.bf16.mxu0 %vm453_vm1, %v3071_v6  ;;  %2722 = vset.pattern.permute.xlu1 %v2763_v44  ;;  %v1039_v17 = vshll.u32 %v3249_v24, 16 }
  0x44   : > { %2533 = vmatmul.mubr.msk.bf16.gmra.mxu1 %vm453_vm1, %v2871_v18  ;;  %v3178_v18 = vsel %vm1478_vm6, %v1500_v26, %v1504_v46  ;;  %v3191_v32 = vor.u32 %v1512_v4, %v1509_v56  ;;  %v1005_v26 = vsel %vm998_vm7, %v1001_v7, %v3083_v45  ;;  %1922 = vperm.xlu0 %2721, %v1904_v10   ;;  %v1014_v7 = vrot.slane %v2888_v28, 1  ;;  %v1911_v10 = vld [vmem:[%s3152_s14 + $0x38] sm:$0xff] }
  0x45   : > { %2536 = vmatprep.mubr.msk.bf16.mxu1 %vm453_vm1, %v2908_v39  ;;  %v723_v39 = vsel %vm706_vm3, %v3032_v48, %v722_v2  ;;  %v1011_v2 = vrot.slane %v2877_v22, 2  ;;  %1932 = vperm.xlu1 %2722, %v1906_v0   ;;  %v1908_v22 = vld [vmem:[%s3152_s14 + $0x20] sm:$0xff]  ;;  %v1009_v0 = vsel %vm998_vm7, %v3083_v45, %v1008_v8  ;;  %v1018_v4 = vrot.slane %v2935_v54, 1  ;;  %v1910_v54 = vld [vmem:[%s3152_s14 + $0x30] sm:$0xff] }
  0x46   : > { %v3202_v52 = vsel %vm1478_vm6, %v1504_v46, %v3191_v32  ;;  %v1361_v46 = vsel %vm478_vm0, %v2997_v33, 0  ;;  %v3226_v45 = vld [vmem:[%s3628_s2 + $0x20] sm:$0xf]  ;;  %v1016_v28 = vor.u32 %v1015_v40, %v1014_v7  ;;  %v1918_v7 = vld [vmem:[%s3152_s14 + $0x70] sm:$0xff]  ;;  %v1919_v40 = vld [vmem:[%s3152_s14 + $0x78] sm:$0xff] }
  0x47   : > { %v1012_v23 = vor.u32 %v1011_v2, %v1010_v62  ;;  %v1913_v62 = vld [vmem:[%s3152_s14 + $0x48] sm:$0xff]  ;;  %v1914_v2 = vld [vmem:[%s3152_s14 + $0x50] sm:$0xff] }
  0x48   : > { %1927 = vperm.xlu0 %2721, %v1905_v58   ;;  %v870_v58 = vrot.slane %v3007_v36, 1 }
  0x49   : > { %1937 = vperm.xlu1 %2722, %v1907_v34   ;;  %v1013_v56 = vsel %vm998_vm7, %v1008_v8, %v1012_v23  ;;  %v1017_v20 = vsel %vm998_vm7, %v1012_v23, %v1016_v28  ;;  %v1041_v23 = vrot.slane %v1039_v17, 2 }
  0x4a   : > { %2555 = vmatmul.mubr.msk.bf16.gmra.mxu0 %vm453_vm1, %v723_v39  ;;  %v1022_v39 = vrot.slane %v2955_v63, 1  ;;  %v1036_v63 = vshrl.u32 %v3249_v24, 16 }
  0x4b   : > { %2578 = vmatprep.mubr.msk.bf16.mxu0 %vm453_vm1, %v1005_v26  ;;  %v1032_v26 = vrot.slane %v1030_v16, 2  ;;  %v1915_v16 = vld [vmem:[%s3152_s14 + $0x58] sm:$0xff] }
  0x4c   : > { %2537 = vmatmul.mubr.msk.bf16.gmra.mxu1 %vm453_vm1, %v2932_v53  ;;  %1942 = vperm.xlu0 %2721, %v1908_v22   ;;  %v1038_v8 = vrot.slane %v1036_v63, 1  ;;  %v1916_v22 = vld [vmem:[%s3152_s14 + $0x60] sm:$0xff] }
  0x4d   : > { %2560 = vmatprep.mubr.msk.bf16.mxu1 %vm453_vm1, %v2986_v25  ;;  %v1019_v25 = vrot.slane %v2924_v49, 2  ;;  %1947 = vperm.xlu1 %2722, %v1909_v50   ;;  %v2322_v49 = vld [vmem:[%s3628_s2 + $0x1c] sm:$0xf] }
  0x4f   : > { %v1020_v33 = vor.u32 %v1019_v25, %v1018_v4  ;;  %v1549_v4 = vsel %vm478_vm0, %v2322_v49, 0  ;;  %v1350_v25 = vrot.slane %v3105_v38, 2 }
  0x50   : > { %1952 = vperm.xlu0 %2721, %v1910_v54  }
  0x51   : > { %1957 = vperm.xlu1 %2722, %v1911_v10   ;;  %v1021_v44 = vsel %vm998_vm7, %v1016_v28, %v1020_v33 }
  0x52   : > { %2579 = vmatmul.mubr.msk.bf16.vlgmr.msra.gmra.mxu0 %vm453_vm1, %v1009_v0  ;;  %v1917_v0 = vld [vmem:[%s3152_s14 + $0x68] sm:$0xff] }
  0x53   : > { %2613 = vmatpush3.bf16.msra.mxu0 %v1361_v46  ;;  %2582 = vmatprep.mubr.msk.bf16.mxu0 %vm453_vm1, %v1013_v56  ;;  %v872_v46 = vrot.slane %v3249_v24, 1 }
  0x54   : > { %2561 = vmatmul.mubr.msk.bf16.vlgmr.msra.gmra.mxu1 %vm453_vm1, %v2991_v31  ;;  %2677 = vmatprep.subr.msk.bf16.mxu0 %vm478_vm0, %v3226_v45  ;;  %v1023_v31 = vrot.slane %v2950_v61, 2 }
  0x55   : > { %2595 = vmatpush3.bf16.msra.mxu1 %v1229_v27  ;;  %2564 = vmatprep.mubr.msk.bf16.mxu1 %vm453_vm1, %v3054_v60  ;;  %v1029_v60 = vrot.slane %v1027_v12, 1 }
  0x56   : > { %2676 = vmatprep.subr.msk.bf16.mxu1 %vm478_vm0, %v2322_v49  ;;  %1962 = vperm.xlu0 %2721, %v1912_v30   ;;  %v1024_v61 = vor.u32 %v1023_v31, %v1022_v39 }
  0x57   : > { %1967 = vperm.xlu1 %2722, %v1913_v62   ;;  %v1033_v12 = vor.u32 %v1032_v26, %v1029_v60 }
  0x58   : > { %v1025_v34 = vsel %vm998_vm7, %v1020_v33, %v1024_v61 }
  0x59   : > { %v1034_v50 = vsel %vm998_vm7, %v1024_v61, %v1033_v12 }
  0x5a   : > { %2583 = vmatmul.mubr.msk.bf16.gmra.mxu0 %vm453_vm1, %v1017_v20  ;;  %1972 = vperm.xlu0 %2721, %v1914_v2  }
  0x5b   : > { %2586 = vmatprep.mubr.msk.bf16.mxu0 %vm453_vm1, %v1021_v44  ;;  %1977 = vperm.xlu1 %2722, %v1915_v16  }
  0x5c   : > { %2565 = vmatmul.mubr.msk.bf16.gmra.mxu1 %vm453_vm1, %v3059_v1  ;;  %v871_v1 = vsel %vm706_vm3, %v3032_v48, %v870_v58  ;;  %v873_v48 = vsel %vm706_vm3, %v870_v58, %v872_v46 }
  0x5d   : > { %2568 = vmatprep.mubr.msk.bf16.mxu1 %vm453_vm1, %v3067_v5  ;;  %v1042_v5 = vor.u32 %v1041_v23, %v1038_v8 }
  0x5e   : > { %1982 = vperm.xlu0 %2721, %v1916_v22  }
  0x5f   : > { %1987 = vperm.xlu1 %2722, %v1917_v0   ;;  %v1043_v56 = vsel %vm998_vm7, %v1033_v12, %v1042_v5 }
  0x62   : > { %2587 = vmatmul.mubr.msk.bf16.gmra.mxu0 %vm453_vm1, %v1025_v34  ;;  %1992 = vperm.xlu0 %2721, %v1918_v7  }
  0x63   : > { %2590 = vmatprep.mubr.msk.bf16.mxu0 %vm453_vm1, %v1034_v50  ;;  %1997 = vperm.xlu1 %2722, %v1919_v40  }
  0x64   : > { %2569 = vmatmul.mubr.msk.bf16.gmra.mxu1 %vm453_vm1, %v3071_v6  ;;  %v1709_v6 = vsel %vm478_vm0, %v3226_v45, 0  ;;  %v371_v45 = vld [vmem:[%s2902_s26 + $0x20] sm:$0xff]  ;;  %s2678_s26 = smul.u32 48, %s3687_s19 }
  0x65   : > { %2572 = vmatprep.mubr.msk.bf16.mxu1 %vm453_vm1, %v871_v1  ;;  %v1345_v27 = vpack.c.bf16 %v371_v45, %v371_v45 }
  0x66   : > { %s3530_s28 = sadd.s32 %s2678_s26, %s3691_s27 }
  0x67   : > { %s2258_s27 = sshll.u32 %s3530_s28, 2 }
  0x68   : > { %s3563_s6 = scalar_lea.vmem %s3630_s4, %s2258_s27 }
  0x6a   : > { %2591 = vmatmul.mubr.msk.bf16.gmra.mxu0 %vm453_vm1, %v1043_v56 }
  0x6b   : > { %2614 = vmatprep.mubr.msk.bf16.mxu0 %vm453_vm1, %v3040_v55 }
  0x6c   : > { %2573 = vmatmul.mubr.msk.bf16.gmra.mxu1 %vm453_vm1, %v873_v48 }
  0x6d   : > { %2596 = vmatprep.mubr.msk.bf16.mxu1 %vm453_vm1, %v3025_v43  ;;  %v1200_v43 = vrot.slane %v3007_v36, 2  ;;  %v1352_v36 = vrot.slane %v1345_v27, 2 }
  0x6f   : > { %v1351_v28 = vsel %vm1186_vm4, %v1200_v43, %v1350_v25 }
  0x72   : > { %2615 = vmatmul.mubr.msk.bf16.vlgmr.msra.gmra.mxu0 %vm453_vm1, %v3046_v57 }
  0x73   : > { %2649 = vmatpush3.bf16.msra.mxu0 %v1709_v6  ;;  %2618 = vmatprep.mubr.msk.bf16.mxu0 %vm453_vm1, %v3049_v59 }
  0x74   : > { %2597 = vmatmul.mubr.msk.bf16.vlgmr.msra.gmra.mxu1 %vm453_vm1, %v3040_v55  ;;  %v3633_v55 = vrot.slane %v2932_v53, 2 }
  0x75   : > { %2631 = vmatpush3.bf16.msra.mxu1 %v1549_v4  ;;  %2600 = vmatprep.mubr.msk.bf16.mxu1 %vm453_vm1, %v3046_v57 }
  0x76   : > { %v1201_v57 = vsel %vm1186_vm4, %v3633_v55, %v1200_v43 }
  0x7a   : > { %2619 = vmatmul.mubr.msk.bf16.gmra.mxu0 %vm453_vm1, %v3063_v3 }
  0x7b   : > { %2622 = vmatprep.mubr.msk.bf16.mxu0 %vm453_vm1, %v3078_v9 }
  0x7c   : > { %2601 = vmatmul.mubr.msk.bf16.gmra.mxu1 %vm453_vm1, %v3049_v59  ;;  %v1202_v59 = vrot.slane %v3249_v24, 2 }
  0x7d   : > { %2604 = vmatprep.mubr.msk.bf16.mxu1 %vm453_vm1, %v3063_v3  ;;  %v1353_v3 = vsel %vm1186_vm4, %v1350_v25, %v1352_v36 }
  0x7e   : > { %v1203_v53 = vsel %vm1186_vm4, %v1200_v43, %v1202_v59 }
  0x82   : > { %2623 = vmatmul.mubr.msk.bf16.gmra.mxu0 %vm453_vm1, %v1201_v57 }
  0x83   : > { %2626 = vmatprep.mubr.msk.bf16.mxu0 %vm453_vm1, %v1351_v28 }
  0x84   : > { %2605 = vmatmul.mubr.msk.bf16.gmra.mxu1 %vm453_vm1, %v3078_v9  ;;  %v1516_v9 = vshrl.u32 %v1345_v27, 16 }
  0x85   : > { %2608 = vmatprep.mubr.msk.bf16.mxu1 %vm453_vm1, %v1201_v57 }
  0x8a   : > { %2627 = vmatmul.mubr.msk.bf16.gmra.mxu0 %vm453_vm1, %v1353_v3 }
  0x8b   : > { %2650 = vmatprep.mubr.msk.bf16.mxu0 %vm453_vm1, %v3112_v35  ;;  %v1519_v35 = vshll.u32 %v1345_v27, 16 }
  0x8c   : > { %2609 = vmatmul.mubr.msk.bf16.gmra.mxu1 %vm453_vm1, %v1203_v53 }
  0x8d   : > { %2632 = vmatprep.mubr.msk.bf16.mxu1 %vm453_vm1, %v3122_v47  ;;  %v1521_v47 = vrot.slane %v1519_v35, 3 }
  0x92   : > { %2651 = vmatmul.mubr.msk.bf16.vlgmr.msra.gmra.mxu0 %vm453_vm1, %v3117_v41  ;;  %v1518_v41 = vrot.slane %v1516_v9, 2 }
  0x93   : > { %2654 = vmatprep.mubr.msk.bf16.mxu0 %vm453_vm1, %v3131_v21 }
  0x94   : > { %2633 = vmatmul.mubr.msk.bf16.vlgmr.msra.gmra.mxu1 %vm453_vm1, %v3128_v11  ;;  %v1682_v11 = vrot.slane %v1345_v27, 3  ;;  %v1522_v21 = vor.u32 %v1521_v47, %v1518_v41 }
  0x95   : > { %2636 = vmatprep.mubr.msk.bf16.mxu1 %vm453_vm1, %v3136_v13 }
  0x96   : > { %v1683_v13 = vsel %vm1666_vm5, %v1680_v14, %v1682_v11 }
  0x9a   : > { %2655 = vmatmul.mubr.msk.bf16.gmra.mxu0 %vm453_vm1, %v3139_v19  ;;  %v1523_v19 = vsel %vm1478_vm6, %v3191_v32, %v1522_v21 }
  0x9b   : > { %2658 = vmatprep.mubr.msk.bf16.mxu0 %vm453_vm1, %v3160_v37 }
  0x9c   : > { %2637 = vmatmul.mubr.msk.bf16.gmra.mxu1 %vm453_vm1, %v3157_v29 }
  0x9d   : > { %2640 = vmatprep.mubr.msk.bf16.mxu1 %vm453_vm1, %v3167_v42 }
  0xa2   : > { %2659 = vmatmul.mubr.msk.bf16.gmra.mxu0 %vm453_vm1, %v3170_v51 }
  0xa3   : > { %2662 = vmatprep.mubr.msk.bf16.mxu0 %vm453_vm1, %v3183_v15 }
  0xa4   : > { %2641 = vmatmul.mubr.msk.bf16.gmra.mxu1 %vm453_vm1, %v3178_v18 }
  0xa5   : > { %2644 = vmatprep.mubr.msk.bf16.mxu1 %vm453_vm1, %v3202_v52 }
  0xaa   : > { %2663 = vmatmul.mubr.msk.bf16.gmra.mxu0 %vm453_vm1, %v1683_v13 }
  0xac   : > { %2645 = vmatmul.mubr.msk.bf16.gmra.mxu1 %vm453_vm1, %v1523_v19 }
  0xe2   : > { %v2508_v29 = vpop.f32.mrf.mxu0 }
  0xe3   : > { %v2516_v37 = vpop.f32.mrf.mxu1 }
  0xe4   : > { %v516_v42 = vpop.f32.mrf.mxu0 }
  0xe5   : > { %v548_v51 = vpop.f32.mrf.mxu1 }
  0xe6   : > { %v2509_v18 = vpop.f32.mrf.mxu0 }
  0xe7   : > { %v2517_v15 = vpop.f32.mrf.mxu1 }
  0xe8   : > { %v519_v49 = vpop.f32.mrf.mxu0 }
  0xe9   : > { %v551_v52 = vpop.f32.mrf.mxu1 }
  0xea   : > { %v2512_v54 = vpop.f32.mrf.mxu0 }
  0xeb   : > { %v2520_v33 = vpop.f32.mrf.mxu1 }
  0xec   : > { %v532_v38 = vpop.f32.mrf.mxu0 }
  0xed   : > { %v564_v10 = vpop.f32.mrf.mxu1 }
  0xee   : > { %v2513_v14 = vpop.f32.mrf.mxu0 }
  0xef   : > { %v2521_v20 = vpop.f32.mrf.mxu1 }
  0xf0   : > { %v535_v39 = vpop.f32.mrf.mxu0 }
  0xf1   : > { %v3362_v32 = vpop.f32.mrf.mxu1 }
  0xf2   : > { %v2544_v31 = vpop.f32.mrf.mxu0 }
  0xf4   : > { %v2526_v24 = vpop.f32.mrf.mxu1  ;;  %v785_v30 = vpop.f32.mrf.mxu0 }
  0xf5   : > { %v641_v44 = vadd.f32 %v2526_v24, %v2508_v29 }
  0xf6   : > { %v632_v60 = vpop.f32.mrf.mxu1  ;;  %v2545_v26 = vpop.f32.mrf.mxu0 }
  0xf7   : > { %v3364_v62 = vadd.f32 %v2544_v31, %v641_v44  ;;  %v633_v61 = vadd.f32 %v632_v60, %v516_v42 }
  0xf8   : > { %v2527_v63 = vpop.f32.mrf.mxu1  ;;  %v788_v17 = vpop.f32.mrf.mxu0 }
  0xf9   : > { %v3366_v2 = vadd.f32 %v785_v30, %v633_v61  ;;  %v644_v12 = vadd.f32 %v2527_v63, %v2509_v18 }
  0xfa   : > { %v635_v16 = vpop.f32.mrf.mxu1  ;;  %v2548_v58 = vpop.f32.mrf.mxu0 }
  0xfb   : > { %v3368_v34 = vadd.f32 %v2545_v26, %v644_v12  ;;  %v636_v8 = vadd.f32 %v635_v16, %v519_v49 }
  0xfc   : > { %v2530_v23 = vpop.f32.mrf.mxu1  ;;  %v801_v22 = vpop.f32.mrf.mxu0 }
  0xfd   : > { %v3370_v50 = vadd.f32 %v788_v17, %v636_v8  ;;  %v657_v0 = vadd.f32 %v2530_v23, %v2512_v54 }
  0xfe   : > { %v648_v1 = vpop.f32.mrf.mxu1  ;;  %v2549_v5 = vpop.f32.mrf.mxu0 }
  0xff   : > { %v3372_v7 = vadd.f32 %v2548_v58, %v657_v0  ;;  %v649_v40 = vadd.f32 %v648_v1, %v532_v38 }
 0x100   : > { %v2531_v46 = vpop.f32.mrf.mxu1  ;;  %v804_v56 = vpop.f32.mrf.mxu0 }
 0x101   : > { %v3374_v48 = vadd.f32 %v801_v22, %v649_v40  ;;  %v660_v6 = vadd.f32 %v2531_v46, %v2513_v14 }
 0x102   : > { %v651_v4 = vpop.f32.mrf.mxu1  ;;  %v2552_v43 = vpop.f32.mrf.mxu0 }
 0x103   : > { %v3376_v25 = vadd.f32 %v2549_v5, %v660_v6  ;;  %v652_v45 = vadd.f32 %v651_v4, %v535_v39 }
 0x104   : > { %v2534_v55 = vpop.f32.mrf.mxu1  ;;  %v817_v57 = vpop.f32.mrf.mxu0 }
 0x105   : > { %v3378_v27 = vadd.f32 %v804_v56, %v652_v45  ;;  %v673_v28 = vadd.f32 %v2534_v55, %v2516_v37 }
 0x106   : > { %v664_v36 = vpop.f32.mrf.mxu1  ;;  %v2553_v59 = vpop.f32.mrf.mxu0 }
 0x107   : > { %v3380_v3 = vadd.f32 %v2552_v43, %v673_v28  ;;  %v665_v53 = vadd.f32 %v664_v36, %v548_v51 }
 0x108   : > { %v2535_v9 = vpop.f32.mrf.mxu1  ;;  %v820_v35 = vpop.f32.mrf.mxu0 }
 0x109   : > { %v3382_v41 = vadd.f32 %v817_v57, %v665_v53  ;;  %v676_v47 = vadd.f32 %v2535_v9, %v2517_v15 }
 0x10a   : > { %v667_v11 = vpop.f32.mrf.mxu1  ;;  %v2556_v21 = vpop.f32.mrf.mxu0 }
 0x10b   : > { %v3384_v13 = vadd.f32 %v2553_v59, %v676_v47  ;;  %v668_v19 = vadd.f32 %v667_v11, %v551_v52 }
 0x10c   : > { %v2538_v29 = vpop.f32.mrf.mxu1  ;;  %v833_v42 = vpop.f32.mrf.mxu0 }
 0x10d   : > { %v3386_v18 = vadd.f32 %v820_v35, %v668_v19  ;;  %v689_v37 = vadd.f32 %v2538_v29, %v2520_v33 }
 0x10e   : > { %v680_v49 = vpop.f32.mrf.mxu1  ;;  %v2557_v54 = vpop.f32.mrf.mxu0 }
 0x10f   : > { %v3388_v38 = vadd.f32 %v2556_v21, %v689_v37  ;;  %v681_v51 = vadd.f32 %v680_v49, %v564_v10 }
 0x110   : > { %v2539_v14 = vpop.f32.mrf.mxu1  ;;  %v836_v39 = vpop.f32.mrf.mxu0 }
 0x111   : > { %v3390_v31 = vadd.f32 %v833_v42, %v681_v51  ;;  %v692_v15 = vadd.f32 %v2539_v14, %v2521_v20 }
 0x112   : > { %v683_v24 = vpop.f32.mrf.mxu1  ;;  %v3392_v30 = vpop.f32.mrf.mxu0 }
 0x113   : > { %v3394_v44 = vadd.f32 %v2557_v54, %v692_v15  ;;  %v684_v52 = vadd.f32 %v683_v24, %v3362_v32 }
 0x114   : > { %v2562_v60 = vpop.f32.mrf.mxu1  ;;  %v3397_v26 = vpop.f32.mrf.mxu0 }
 0x115   : > { %v3399_v33 = vadd.f32 %v836_v39, %v684_v52 }
 0x116   : > { %v917_v61 = vpop.f32.mrf.mxu1  ;;  %v3401_v63 = vpop.f32.mrf.mxu0 }
 0x118   : > { %v2563_v10 = vpop.f32.mrf.mxu1  ;;  %v3403_v17 = vpop.f32.mrf.mxu0 }
 0x11a   : > { %v920_v12 = vpop.f32.mrf.mxu1  ;;  %v3405_v20 = vpop.f32.mrf.mxu0 }
 0x11c   : > { %v2566_v16 = vpop.f32.mrf.mxu1  ;;  %v3407_v58 = vpop.f32.mrf.mxu0 }
 0x11e   : > { %v3409_v8 = vpop.f32.mrf.mxu1  ;;  %v3411_v32 = vpop.f32.mrf.mxu0 }
 0x120   : > { %v2567_v23 = vpop.f32.mrf.mxu1  ;;  %v3413_v22 = vpop.f32.mrf.mxu0 }
 0x122   : > { %v936_v0 = vpop.f32.mrf.mxu1  ;;  %v3415_v1 = vpop.f32.mrf.mxu0 }
 0x124   : > { %v3417_v5 = vpop.f32.mrf.mxu1  ;;  %v3419_v40 = vpop.f32.mrf.mxu0 }
 0x126   : > { %v3421_v46 = vpop.f32.mrf.mxu1  ;;  %v3423_v56 = vpop.f32.mrf.mxu0 }
 0x128   : > { %v3425_v6 = vpop.f32.mrf.mxu1  ;;  %v3427_v4 = vpop.f32.mrf.mxu0 }
 0x129   : > { %3634 = vst [vmem:[#allocation2_spill] sm:$0xff] %v3427_v4 }
 0x12a   : > { %v3429_v43 = vpop.f32.mrf.mxu1  ;;  %v3431_v45 = vpop.f32.mrf.mxu0 }
 0x12b   : > { %3635 = vst [vmem:[#allocation3_spill] sm:$0xff] %v3431_v45 }
 0x12c   : > { %v3433_v55 = vpop.f32.mrf.mxu1  ;;  %v3435_v57 = vpop.f32.mrf.mxu0 }
 0x12d   : > { %3636 = vst [vmem:[#allocation4_spill] sm:$0xff] %v3435_v57 }
 0x12e   : > { %v3437_v28 = vpop.f32.mrf.mxu1  ;;  %v3439_v36 = vpop.f32.mrf.mxu0 }
 0x12f   : > { %3637 = vst [vmem:[#allocation5_spill] sm:$0xff] %v3439_v36 }
 0x130   : > { %v3441_v59 = vpop.f32.mrf.mxu1  ;;  %v3443_v53 = vpop.f32.mrf.mxu0 }
 0x131   : > { %3638 = vst [vmem:[#allocation6_spill] sm:$0xff] %v3443_v53 }
 0x132   : > { %v3445_v9 = vpop.f32.mrf.mxu1  ;;  %v2616_v35 = vpop.f32.mrf.mxu0 }
 0x134   : > { %v2598_v47 = vpop.f32.mrf.mxu1  ;;  %v1397_v11 = vpop.f32.mrf.mxu0 }
 0x136   : > { %v1265_v21 = vpop.f32.mrf.mxu1  ;;  %v3447_v19 = vpop.f32.mrf.mxu0 }
 0x138   : > { %v2599_v29 = vpop.f32.mrf.mxu1  ;;  %v3449_v42 = vpop.f32.mrf.mxu0 }
 0x13a   : > { %v1268_v37 = vpop.f32.mrf.mxu1  ;;  %v3451_v49 = vpop.f32.mrf.mxu0 }
 0x13b   : > { %3639 = vst [vmem:[#allocation7_spill] sm:$0xff] %v3451_v49 }
 0x13c   : > { %v3453_v54 = vpop.f32.mrf.mxu1  ;;  %v3455_v51 = vpop.f32.mrf.mxu0 }
 0x13d   : > { %3640 = vst [vmem:[#allocation8_spill] sm:$0xff] %v3455_v51 }
 0x13e   : > { %v3457_v14 = vpop.f32.mrf.mxu1  ;;  %v3459_v39 = vpop.f32.mrf.mxu0 }
 0x13f   : > { %3641 = vst [vmem:[#allocation9_spill] sm:$0xff] %v3459_v39  ;;  %v982_v39 = vadd.f32 %v2562_v60, %v3364_v62 }
 0x140   : > { %v3461_v15 = vpop.f32.mrf.mxu1  ;;  %v3463_v24 = vpop.f32.mrf.mxu0 }
 0x141   : > { %3642 = vst [vmem:[#allocation10_spill] sm:$0xff] %v3461_v15  ;;  %3643 = vst [vmem:[#allocation11_spill] sm:$0xff] %v3463_v24 }
 0x142   : > { %v3465_v52 = vpop.f32.mrf.mxu1  ;;  %v3467_v53 = vpop.f32.mrf.mxu0 }
 0x143   : > { %3644 = vst [vmem:[#allocation12_spill] sm:$0xff] %v3465_v52  ;;  %3645 = vst [vmem:[#allocation13_spill] sm:$0xff] %v3467_v53  ;;  %v980_v53 = vadd.f32 %v917_v61, %v3366_v2  ;;  %v3501_v2 = vpop.permute.xlu1 %1932  ;;  %v986_v61 = vadd.f32 %v2566_v16, %v3372_v7  ;;  %v990_v16 = vadd.f32 %v3417_v5, %v3380_v3 }
 0x144   : > { %v3469_v36 = vpop.f32.mrf.mxu1  ;;  %v3471_v57 = vpop.f32.mrf.mxu0  ;;  %v988_v3 = vadd.f32 %v3421_v46, %v3382_v41  ;;  %v991_v5 = vadd.f32 %v3425_v6, %v3384_v13  ;;  %v994_v41 = vadd.f32 %v3433_v55, %v3388_v38  ;;  %v992_v13 = vadd.f32 %v3437_v28, %v3390_v31 }
 0x145   : > { %3646 = vst [vmem:[#allocation14_spill] sm:$0xff] %v3469_v36  ;;  %3647 = vst [vmem:[#allocation15_spill] sm:$0xff] %v3471_v57  ;;  %v983_v57 = vadd.f32 %v2563_v10, %v3368_v34  ;;  %v1168_v60 = vadd.f32 %v3397_v26, %v980_v53  ;;  %v984_v10 = vadd.f32 %v3409_v8, %v3374_v48 }
 0x146   : > { %v3473_v49 = vpop.f32.mrf.mxu1  ;;  %v3475_v45 = vpop.f32.mrf.mxu0  ;;  %v985_v26 = vadd.f32 %v936_v0, %v3378_v27  ;;  %v1174_v48 = vadd.f32 %v3405_v20, %v986_v61  ;;  %v995_v46 = vadd.f32 %v3441_v59, %v3394_v44  ;;  %v1176_v38 = vadd.f32 %v3419_v40, %v988_v3 }
 0x147   : > { %3648 = vst [vmem:[#allocation16_spill] sm:$0xff] %v3473_v49  ;;  %3649 = vst [vmem:[#allocation17_spill] sm:$0xff] %v3475_v45  ;;  %v3492_v49 = vpop.permute.xlu0 %1922  ;;  %v1170_v45 = vadd.f32 %v3392_v30, %v982_v39  ;;  %v1171_v30 = vadd.f32 %v3401_v63, %v983_v57  ;;  %v987_v39 = vadd.f32 %v2567_v23, %v3376_v25 }
 0x148   : > { %v3477_v51 = vpop.f32.mrf.mxu1  ;;  %v3479_v4 = vpop.f32.mrf.mxu0  ;;  %v1172_v27 = vadd.f32 %v3407_v58, %v984_v10  ;;  %v1178_v58 = vadd.f32 %v3415_v1, %v990_v16  ;;  %v1334_v6 = vadd.f32 %v3453_v54, %v1174_v48  ;;  %v1179_v55 = vadd.f32 %v3423_v56, %v991_v5  ;;  %v3655_v54 = vld [vmem:[#allocation2_spill] sm:$0xff]  ;;  %v3659_v56 = vld [vmem:[#allocation7_spill] sm:$0xff] }
 0x149   : > { %3650 = vst [vmem:[#allocation18_spill] sm:$0xff] %v3477_v51  ;;  %3651 = vst [vmem:[#allocation19_spill] sm:$0xff] %v3479_v4  ;;  %v1175_v0 = vadd.f32 %v3411_v32, %v987_v39  ;;  %v989_v32 = vadd.f32 %v3429_v43, %v3386_v18  ;;  %v993_v31 = vadd.f32 %v3445_v9, %v3399_v33  ;;  %v3658_v39 = vld [vmem:[#allocation4_spill] sm:$0xff] }
 0x14a   : > { %v3482_v15 = vpop.f32.mrf.mxu1  ;;  %v3484_v24 = vpop.f32.mrf.mxu0  ;;  %v1332_v18 = vadd.f32 %v3457_v14, %v1172_v27  ;;  %v3556_v40 = vadd.f32 %v3658_v39, %v992_v13 }
 0x14b   : > { %3652 = vst [vmem:[#allocation20_spill] sm:$0xff] %v3484_v24  ;;  %v981_v24 = vadd.f32 %v920_v12, %v3370_v50  ;;  %v3519_v63 = vpop.permute.xlu0 %1927 }
 0x14c   : > { %v3487_v52 = vpop.f32.mrf.mxu1  ;;  %v3489_v36 = vpop.f32.mrf.mxu0 }
 0x14d   : > { %3653 = vst [vmem:[#allocation21_spill] sm:$0xff] %v3489_v36  ;;  %v1330_v36 = vadd.f32 %v2598_v47, %v1170_v45  ;;  %v1169_v7 = vadd.f32 %v3403_v17, %v981_v24  ;;  %v1331_v45 = vadd.f32 %v2599_v29, %v1171_v30  ;;  %v1938_v47 = vpop.permute.xlu1 %1937  ;;  %v1173_v17 = vadd.f32 %v3413_v22, %v985_v26  ;;  %v3657_v30 = vld [vmem:[#allocation3_spill] sm:$0xff] }
 0x14e   : > { %v3495_v51 = vpop.f32.mrf.mxu1  ;;  %v3497_v62 = vpop.f32.mrf.mxu0  ;;  %v1177_v24 = vadd.f32 %v3655_v54, %v989_v32  ;;  %v1182_v10 = vadd.f32 %v3657_v30, %v994_v41  ;;  %v1466_v26 = vadd.f32 %v3659_v56, %v1334_v6  ;;  %v3665_v41 = vld [vmem:[#allocation14_spill] sm:$0xff] }
 0x14f   : > { %3654 = vst [vmem:[#allocation22_spill] sm:$0xff] %v3497_v62  ;;  %v1328_v62 = vadd.f32 %v1265_v21, %v1168_v60  ;;  %v1462_v8 = vadd.f32 %v2616_v35, %v1330_v36  ;;  %v1329_v53 = vadd.f32 %v1268_v37, %v1169_v7  ;;  %v1463_v35 = vadd.f32 %v3447_v19, %v1331_v45  ;;  %v1943_v43 = vpop.permute.xlu0 %1942  ;;  %v3660_v7 = vld [vmem:[#allocation5_spill] sm:$0xff]  ;;  %v3661_v45 = vld [vmem:[#allocation8_spill] sm:$0xff] }
 0x150   : > { %v3504_v4 = vpop.f32.mrf.mxu1  ;;  %v3506_v34 = vpop.f32.mrf.mxu0  ;;  %v3566_v16 = vadd.f32 %v3660_v7, %v995_v46  ;;  %v1464_v48 = vadd.f32 %v3661_v45, %v1332_v18  ;;  %v1338_v13 = vadd.f32 %v3665_v41, %v1178_v58  ;;  %v3666_v46 = vld [vmem:[#allocation16_spill] sm:$0xff] }
 0x151   : > { %v1460_v57 = vadd.f32 %v1397_v11, %v1328_v62  ;;  %v1461_v1 = vadd.f32 %v3449_v42, %v1329_v53  ;;  %v3656_v62 = vld [vmem:[#allocation10_spill] sm:$0xff]  ;;  %v3552_v60 = vpop.permute.xlu1 %1947  ;;  %v1336_v6 = vadd.f32 %v3666_v46, %v1176_v38 }
 0x152   : > { %v3513_v50 = vpop.f32.mrf.mxu1  ;;  %v2652_v12 = vpop.f32.mrf.mxu0  ;;  %v1335_v42 = vadd.f32 %v3656_v62, %v1175_v0  ;;  %v3663_v0 = vld [vmem:[#allocation12_spill] sm:$0xff] }
 0x154   : > { %v2634_v25 = vpop.f32.mrf.mxu1  ;;  %v1745_v23 = vpop.f32.mrf.mxu0 }
 0x155   : > { %v1650_v21 = vadd.f32 %v2634_v25, %v1462_v8 }
 0x156   : > { %v1585_v20 = vpop.f32.mrf.mxu1  ;;  %v2653_v36 = vpop.f32.mrf.mxu0 }
 0x157   : > { %v1648_v22 = vadd.f32 %v1585_v20, %v1460_v57  ;;  %v1810_v44 = vadd.f32 %v2652_v12, %v1650_v21  ;;  %v3664_v21 = vld [vmem:[#allocation9_spill] sm:$0xff] }
 0x158   : > { %v2635_v11 = vpop.f32.mrf.mxu1  ;;  %v1748_v29 = vpop.f32.mrf.mxu0  ;;  %v1467_v20 = vadd.f32 %v3664_v21, %v1335_v42 }
 0x159   : > { %v1808_v19 = vadd.f32 %v1745_v23, %v1648_v22  ;;  %v1651_v37 = vadd.f32 %v2635_v11, %v1463_v35  ;;  %v3662_v23 = vld [vmem:[#allocation6_spill] sm:$0xff]  ;;  %v2002_v57 = vmul.f32 %v3501_v2, %v1810_v44 }
 0x15a   : > { %v1588_v28 = vpop.f32.mrf.mxu1  ;;  %v2656_v59 = vpop.f32.mrf.mxu0  ;;  %v3570_v27 = vadd.f32 %v3662_v23, %v993_v31  ;;  %v3671_v23 = vld [vmem:[#allocation17_spill] sm:$0xff] }
 0x15b   : > { %v1811_v14 = vadd.f32 %v2653_v36, %v1651_v37  ;;  %v1649_v61 = vadd.f32 %v1588_v28, %v1461_v1  ;;  %v2000_v33 = vmul.f32 %v3492_v49, %v1808_v19  ;;  %v1333_v49 = vadd.f32 %v3663_v0, %v1173_v17  ;;  %v1953_v36 = vpop.permute.xlu0 %1952  ;;  %v1958_v1 = vpop.permute.xlu1 %1957  ;;  %v3667_v28 = vld [vmem:[#allocation11_spill] sm:$0xff] }
 0x15c   : > { %v2638_v9 = vpop.f32.mrf.mxu1  ;;  %v1761_v12 = vpop.f32.mrf.mxu0 }
 0x15d   : > { %v2384_v8 = vpack.c.bf16 %v1811_v14, %v1810_v44  ;;  %v1809_v25 = vadd.f32 %v1748_v29, %v1649_v61  ;;  %v1654_v53 = vadd.f32 %v2638_v9, %v1466_v26  ;;  %v2037_v11 = vmul.f32 %v2000_v33, %v2000_v33  ;;  %v3670_v26 = vld [vmem:[#allocation15_spill] sm:$0xff] }
 0x15e   : > { %v1601_v3 = vpop.f32.mrf.mxu1  ;;  %v2657_v5 = vpop.f32.mrf.mxu0  ;;  %v2003_v17 = vmul.f32 %v1938_v47, %v1811_v14  ;;  %v1465_v54 = vadd.f32 %v3667_v28, %v1333_v49  ;;  %v3669_v14 = vld [vmem:[#allocation13_spill] sm:$0xff]  ;;  %v1468_v9 = vadd.f32 %v3670_v26, %v1336_v6 }
 0x15f   : > { %2416 = vst [vmem:[%s3563_s6 + $0x8] sm:$0xff] %v2384_v8   ;;  %v2379_v32 = vpack.c.bf16 %v1809_v25, %v1808_v19  ;;  %v2001_v35 = vmul.f32 %v3519_v63, %v1809_v25  ;;  %v1652_v22 = vadd.f32 %v1601_v3, %v1464_v48  ;;  %v3668_v19 = vld [vmem:[#allocation18_spill] sm:$0xff]  ;;  %v2039_v63 = vmul.f32 %v2002_v57, %v2002_v57  ;;  %v1963_v48 = vpop.permute.xlu0 %1962 }
 0x160   : > { %v2639_v29 = vpop.f32.mrf.mxu1  ;;  %v1764_v2 = vpop.f32.mrf.mxu0  ;;  %v1339_v62 = vadd.f32 %v3668_v19, %v1179_v55  ;;  %v1814_v42 = vadd.f32 %v2656_v59, %v1654_v53  ;;  %v1470_v56 = vadd.f32 %v3669_v14, %v1338_v13  ;;  %v2040_v55 = vmul.f32 %v2003_v17, %v2003_v17  ;;  %v3675_v14 = vld [vmem:[#allocation22_spill] sm:$0xff] }
 0x161   : > { %2380 = vst [vmem:[%s3563_s6] sm:$0xff] %v2379_v32   ;;  %v2016_v18 = vadd.f32 %v2001_v35, %v2000_v33  ;;  %v2038_v37 = vmul.f32 %v2001_v35, %v2001_v35  ;;  %v1812_v31 = vadd.f32 %v1761_v12, %v1652_v22  ;;  %v1655_v44 = vadd.f32 %v2639_v29, %v1467_v20  ;;  %v3672_v32 = vld [vmem:[#allocation19_spill] sm:$0xff] }
 0x162   : > { %v1604_v61 = vpop.f32.mrf.mxu1  ;;  %v2660_v58 = vpop.f32.mrf.mxu0  ;;  %v1337_v33 = vadd.f32 %v3482_v15, %v1177_v24  ;;  %v1471_v0 = vadd.f32 %v3671_v23, %v1339_v62  ;;  %v2006_v22 = vmul.f32 %v1953_v36, %v1814_v42  ;;  %v1343_v29 = vadd.f32 %v3504_v4, %v3566_v16  ;;  %v3674_v4 = vld [vmem:[#allocation21_spill] sm:$0xff] }
 0x163   : > { %v2017_v30 = vadd.f32 %v2016_v18, %v2002_v57  ;;  %v2053_v38 = vadd.f32 %v2038_v37, %v2037_v11  ;;  %v2004_v39 = vmul.f32 %v1943_v43, %v1812_v31  ;;  %v1815_v47 = vadd.f32 %v2657_v5, %v1655_v44  ;;  %v1968_v5 = vpop.permute.xlu1 %1967 }
 0x164   : > { %v1653_v12 = vadd.f32 %v1604_v61, %v1465_v54  ;;  %v2642_v7 = vpop.f32.mrf.mxu1  ;;  %v1777_v45 = vpop.f32.mrf.mxu0  ;;  %v1342_v43 = vadd.f32 %v3487_v52, %v1182_v10  ;;  %v1469_v35 = vadd.f32 %v3672_v32, %v1337_v33  ;;  %v1340_v52 = vadd.f32 %v3495_v51, %v3556_v40 }
 0x165   : > { %v2054_v8 = vadd.f32 %v2053_v38, %v2039_v63  ;;  %v2018_v59 = vadd.f32 %v2017_v30, %v2003_v17  ;;  %v2394_v25 = vpack.c.bf16 %v1815_v47, %v1814_v42  ;;  %v2041_v49 = vmul.f32 %v2004_v39, %v2004_v39 }
 0x166   : > { %v1813_v57 = vadd.f32 %v1764_v2, %v1653_v12  ;;  %v1617_v53 = vpop.f32.mrf.mxu1  ;;  %v2661_v3 = vpop.f32.mrf.mxu0  ;;  %v1658_v24 = vadd.f32 %v2642_v7, %v1470_v56  ;;  %v2007_v2 = vmul.f32 %v1958_v1, %v1815_v47  ;;  %v2043_v63 = vmul.f32 %v2006_v22, %v2006_v22 }
 0x167   : > { %v2019_v21 = vadd.f32 %v2018_v59, %v2004_v39  ;;  %v2055_v15 = vadd.f32 %v2054_v8, %v2040_v55  ;;  %2418 = vst [vmem:[%s3563_s6 + $0x18] sm:$0xff] %v2394_v25   ;;  %v1656_v20 = vadd.f32 %v1617_v53, %v1468_v9  ;;  %v1472_v16 = vadd.f32 %v3674_v4, %v1340_v52  ;;  %v1978_v38 = vpop.permute.xlu1 %1977 }
 0x168   : > { %v2389_v41 = vpack.c.bf16 %v1813_v57, %v1812_v31  ;;  %v2005_v13 = vmul.f32 %v3552_v60, %v1813_v57  ;;  %v2643_v46 = vpop.f32.mrf.mxu1  ;;  %v1780_v6 = vpop.f32.mrf.mxu0  ;;  %v3673_v31 = vld [vmem:[#allocation20_spill] sm:$0xff]  ;;  %v1818_v54 = vadd.f32 %v2660_v58, %v1658_v24  ;;  %v1341_v1 = vadd.f32 %v3513_v50, %v3570_v27 }
 0x169   : > { %v2056_v10 = vadd.f32 %v2055_v15, %v2041_v49  ;;  %v1816_v11 = vadd.f32 %v1777_v45, %v1656_v20  ;;  %v1659_v17 = vadd.f32 %v2643_v46, %v1471_v0  ;;  %v1474_v28 = vadd.f32 %v3673_v31, %v1342_v43  ;;  %v1973_v60 = vpop.permute.xlu0 %1972 }
 0x16a   : > { %2417 = vst [vmem:[%s3563_s6 + $0x10] sm:$0xff] %v2389_v41   ;;  %v2020_v18 = vadd.f32 %v2019_v21, %v2005_v13  ;;  %v2042_v37 = vmul.f32 %v2005_v13, %v2005_v13  ;;  %v1620_v44 = vpop.f32.mrf.mxu1  ;;  %v2664_v36 = vpop.f32.mrf.mxu0  ;;  %v1475_v56 = vadd.f32 %v3675_v14, %v1343_v29  ;;  %v2044_v58 = vmul.f32 %v2007_v2, %v2007_v2 }
 0x16b   : > { %v1819_v19 = vadd.f32 %v2661_v3, %v1659_v17  ;;  %v1657_v62 = vadd.f32 %v1620_v44, %v1469_v35  ;;  %v2008_v42 = vmul.f32 %v1963_v48, %v1816_v11  ;;  %v2010_v55 = vmul.f32 %v1973_v60, %v1818_v54 }
 0x16c   : > { %v2021_v51 = vadd.f32 %v2020_v18, %v2006_v22  ;;  %v2057_v40 = vadd.f32 %v2056_v10, %v2042_v37  ;;  %v2646_v61 = vpop.f32.mrf.mxu1  ;;  %v1793_v30 = vpop.f32.mrf.mxu0  ;;  %v1473_v23 = vadd.f32 %v3506_v34, %v1341_v1 }
 0x16d   : > { %v2404_v39 = vpack.c.bf16 %v1819_v19, %v1818_v54  ;;  %v1817_v47 = vadd.f32 %v1780_v6, %v1657_v62  ;;  %v1662_v45 = vadd.f32 %v2646_v61, %v1474_v28  ;;  %v2045_v59 = vmul.f32 %v2008_v42, %v2008_v42  ;;  %v1983_v0 = vpop.permute.xlu0 %1982 }
 0x16e   : > { %v2058_v26 = vadd.f32 %v2057_v40, %v2043_v63  ;;  %v2022_v9 = vadd.f32 %v2021_v51, %v2007_v2  ;;  %v1633_v33 = vpop.f32.mrf.mxu1  ;;  %v2665_v27 = vpop.f32.mrf.mxu0  ;;  %v2011_v3 = vmul.f32 %v1978_v38, %v1819_v19  ;;  %v2047_v35 = vmul.f32 %v2010_v55, %v2010_v55 }
 0x16f   : > { %2420 = vst [vmem:[%s3563_s6 + $0x28] sm:$0xff] %v2404_v39   ;;  %v2399_v12 = vpack.c.bf16 %v1817_v47, %v1816_v11  ;;  %v2009_v7 = vmul.f32 %v1968_v5, %v1817_v47  ;;  %v1660_v48 = vadd.f32 %v1633_v33, %v1472_v16  ;;  %v1988_v5 = vpop.permute.xlu1 %1987  ;;  %v1822_v24 = vadd.f32 %v2664_v36, %v1662_v45 }
 0x170   : > { %v2023_v8 = vadd.f32 %v2022_v9, %v2008_v42  ;;  %v2059_v25 = vadd.f32 %v2058_v26, %v2044_v58  ;;  %v2647_v50 = vpop.f32.mrf.mxu1  ;;  %v1796_v34 = vpop.f32.mrf.mxu0  ;;  %v2048_v52 = vmul.f32 %v2011_v3, %v2011_v3 }
 0x171   : > { %2419 = vst [vmem:[%s3563_s6 + $0x20] sm:$0xff] %v2399_v12   ;;  %v2046_v43 = vmul.f32 %v2009_v7, %v2009_v7  ;;  %v1820_v49 = vadd.f32 %v1793_v30, %v1660_v48  ;;  %v1663_v57 = vadd.f32 %v2647_v50, %v1475_v56  ;;  %v1993_v17 = vpop.permute.xlu0 %1992 }
 0x172   : > { %v2060_v53 = vadd.f32 %v2059_v25, %v2045_v59  ;;  %v2024_v21 = vadd.f32 %v2023_v8, %v2009_v7  ;;  %v1636_v15 = vpop.f32.mrf.mxu1  ;;  %v2014_v18 = vmul.f32 %v1993_v17, %v1822_v24 }
 0x173   : > { %v1823_v20 = vadd.f32 %v2665_v27, %v1663_v57  ;;  %v1661_v32 = vadd.f32 %v1636_v15, %v1473_v23  ;;  %v2012_v13 = vmul.f32 %v1983_v0, %v1820_v49  ;;  %v1998_v31 = vpop.permute.xlu1 %1997 }
 0x174   : > { %v2025_v22 = vadd.f32 %v2024_v21, %v2010_v55  ;;  %v2061_v41 = vadd.f32 %v2060_v53, %v2046_v43  ;;  %v2051_v62 = vmul.f32 %v2014_v18, %v2014_v18 }
 0x175   : > { %v2414_v46 = vpack.c.bf16 %v1823_v20, %v1822_v24  ;;  %v1821_v6 = vadd.f32 %v1796_v34, %v1661_v32  ;;  %v2049_v44 = vmul.f32 %v2012_v13, %v2012_v13  ;;  %v2015_v54 = vmul.f32 %v1998_v31, %v1823_v20 }
 0x176   : > { %v2062_v10 = vadd.f32 %v2061_v41, %v2047_v35  ;;  %v2026_v11 = vadd.f32 %v2025_v22, %v2011_v3 }
 0x177   : > { %2422 = vst [vmem:[%s3563_s6 + $0x38] sm:$0xff] %v2414_v46   ;;  %v2409_v29 = vpack.c.bf16 %v1821_v6, %v1820_v49  ;;  %v2013_v2 = vmul.f32 %v1988_v5, %v1821_v6  ;;  %v2052_v40 = vmul.f32 %v2015_v54, %v2015_v54 }
 0x178   : > { %v2027_v37 = vadd.f32 %v2026_v11, %v2012_v13  ;;  %v2063_v36 = vadd.f32 %v2062_v10, %v2048_v52 }
 0x179   : > { %2421 = vst [vmem:[%s3563_s6 + $0x30] sm:$0xff] %v2409_v29   ;;  %v2050_v28 = vmul.f32 %v2013_v2, %v2013_v2 }
 0x17a   : > { %v2064_v60 = vadd.f32 %v2063_v36, %v2049_v44  ;;  %v2028_v19 = vadd.f32 %v2027_v37, %v2013_v2 }
 0x17c   : > { %v2029_v63 = vadd.f32 %v2028_v19, %v2014_v18  ;;  %v2065_v51 = vadd.f32 %v2064_v60, %v2050_v28 }
 0x17e   : > { %v2030_v42 = vadd.f32 %v2029_v63, %v2015_v54  ;;  %v2066_v61 = vadd.f32 %v2065_v51, %v2051_v62 }
 0x180   : > { %v2031_v30 = vrot.slane %v2030_v42, 4  ;;  %v2067_v4 = vadd.f32 %v2066_v61, %v2052_v40 }
 0x182   : > { %v2032_v16 = vadd.f32 %v2031_v30, %v2030_v42  ;;  %v2068_v1 = vrot.slane %v2067_v4, 4 }
 0x184   : > { %v2033_v38 = vrot.slane %v2032_v16, 2  ;;  %v2069_v39 = vadd.f32 %v2068_v1, %v2067_v4 }
 0x186   : > { %v2034_v47 = vadd.f32 %v2033_v38, %v2032_v16  ;;  %v2070_v14 = vrot.slane %v2069_v39, 2 }
 0x188   : > { %v2035_v56 = vrot.slane %v2034_v47, 1  ;;  %v2071_v58 = vadd.f32 %v2070_v14, %v2069_v39 }
 0x18a   : > { %v2072_v26 = vrot.slane %v2071_v58, 1  ;;  %v2036_v9 = vadd.f32 %v2035_v56, %v2034_v47 }
 0x18c   : > { %v2073_v33 = vadd.f32 %v2072_v26, %v2071_v58 }
 0x18e   : > { %v2075_v12 = vsel %vm2074_vm8, %v2036_v9, %v2073_v33 }
 0x18f   : > { %2076 = vst [vmem:[%s349_s12] sm:$0x3] %v2075_v12 }
 0x190 PF: > { %s16_s22 = sadd.s32 1, %s2761_s22   ;;  %s3676_s18 = smov %s2753_s20 }
 0x191   : > { %p13_p10 = scmp.ge.s32.totalorder %s16_s22, 8   ;;  %s3677_s19 = smov %s2757_s21 }
 0x192   : > { %s3678_s20 = smov %s3681_s23  ;;  %s3679_s21 = smov %s3685_s24 }
 0x193   :  { %15 = sbr.rel (!%p13_p10) target bundleno = 3 (0x3), region = 92 }

</bundles_post_ra>
